<compile_context>
chip_gen: v7x
topology: tpu7x:2x2x1
jax: 0.10.0
libtpu: 0.0.40
codegen_flags: <defaults>
</compile_context>

<pallas_src>
import functools

import jax
import jax.numpy as jnp
from jax.experimental import pallas as pl
from jax.experimental.pallas import tpu as pltpu

_MIB = 1024 * 1024


def _round_up(x, m):
    return ((x + m - 1) // m) * m


def _vmem_budget():
    """Return (vmem_limit_bytes, per-step tile VMEM budget), sized conservatively
    so the same code fits v7x (64 MiB/core), v6e (128 MiB) and v5e (16 MiB default
    scoped limit -> we raise it explicitly)."""
    try:
        phys = int(pltpu.get_tpu_info().vmem_capacity_bytes)
    except Exception:  # pragma: no cover -- fall back to smallest-gen assumption
        phys = 64 * _MIB
    limit = min(int(0.75 * phys), 96 * _MIB)
    limit = max(limit, 32 * _MIB)
    budget = min(int(0.8 * limit), 40 * _MIB)
    return limit, budget


def _choose_tile_n(n, dim, c4, tok_bytes, out_bytes, budget, requested):
    # Double-buffered streaming operands (tokens in, expanded out), the
    # single-buffered resident constants, and f32 LN intermediates.
    fixed = dim * c4 * tok_bytes + 2 * c4 * 4 + 2 * c4 * 8 * 4
    per_row = 2 * dim * tok_bytes + 2 * c4 * out_bytes + 2 * c4 * 4
    tile = max(8, int(requested))
    while tile > 8 and fixed + tile * per_row > budget:
        tile //= 2
    tile = max(8, (tile // 8) * 8)
    return min(tile, _round_up(n, 8))


def _patch_expand_kernel(x_ref, w_ref, g_ref, b_ref, gr_ref, gb_ref, o_ref, *, eps):
    # x_ref : (TILE_N, dim)    bf16 tokens
    # w_ref : (dim, 4*dim)     bf16 expand weight (PyTorch Linear weight, transposed)
    # g_ref : (1, 4*dim)       f32 LayerNorm gamma, pre-tiled over the 8 groups
    # b_ref : (1, 4*dim)       f32 LayerNorm beta,  pre-tiled over the 8 groups
    # gr_ref: (4*dim, 8)       f32 group-mean matrix (1/c where col == j // c)
    # gb_ref: (8, 4*dim)       f32 group-broadcast matrix (1 where row == j // c)
    # o_ref : (TILE_N, 4*dim)  expanded + per-group-LayerNormed tokens
    y = jnp.dot(x_ref[...], w_ref[...], preferred_element_type=jnp.float32)

    gr = gr_ref[...]
    gb = gb_ref[...]
    # Per-group statistics on the MXU (avoids 16 narrow cross-lane reductions).
    mu = jnp.dot(y, gr, preferred_element_type=jnp.float32)        # (TILE_N, 8)
    ex2 = jnp.dot(y * y, gr, preferred_element_type=jnp.float32)   # (TILE_N, 8)
    var = jnp.maximum(ex2 - mu * mu, 0.0)
    inv = jax.lax.rsqrt(var + eps)                                 # (TILE_N, 8)
    # Broadcast the per-group stats back to full width via the MXU.
    mu_b = jnp.dot(mu, gb, preferred_element_type=jnp.float32)     # (TILE_N, 4*dim)
    inv_b = jnp.dot(inv, gb, preferred_element_type=jnp.float32)   # (TILE_N, 4*dim)

    out = (y - mu_b) * inv_b * g_ref[...] + b_ref[...]
    # Single lane-dense full-width store (4*dim is a multiple of 128 for dim >= 32).
    o_ref[...] = out.astype(o_ref.dtype)


def _expand_call(tokens, w, gamma, beta, gr, gb, *, tile_n, n_pad, dim, c4, eps,
                 out_dtype, vmem_limit, single_buffer_consts):
    # Constant operands (weight, affine params, group matrices) never change
    # across grid steps -> single-buffer them to halve their VMEM footprint.
    const_kwargs = dict(pipeline_mode=pl.Buffered(1)) if single_buffer_consts else {}
    kernel = functools.partial(_patch_expand_kernel, eps=eps)
    return pl.pallas_call(
        kernel,
        out_shape=jax.ShapeDtypeStruct((n_pad, c4), out_dtype),
        grid_spec=pltpu.PrefetchScalarGridSpec(
            num_scalar_prefetch=0,
            grid=(n_pad // tile_n,),
            in_specs=[
                pl.BlockSpec((tile_n, dim), lambda i: (i, 0)),
                pl.BlockSpec((dim, c4), lambda i: (0, 0), **const_kwargs),
                pl.BlockSpec((1, c4), lambda i: (0, 0), **const_kwargs),
                pl.BlockSpec((1, c4), lambda i: (0, 0), **const_kwargs),
                pl.BlockSpec((c4, 8), lambda i: (0, 0), **const_kwargs),
                pl.BlockSpec((8, c4), lambda i: (0, 0), **const_kwargs),
            ],
            out_specs=pl.BlockSpec((tile_n, c4), lambda i: (i, 0)),
        ),
        compiler_params=pltpu.CompilerParams(
            dimension_semantics=("parallel",),
            vmem_limit_bytes=int(vmem_limit),
        ),
    )(tokens, w, gamma, beta, gr, gb)


def patch_expanding(x, w_expand, ln_gamma, ln_beta, *, input_resolution, eps=1e-5,
                    tile_n=512, compute_dtype=jnp.bfloat16, out_dtype=None):
    """
    x:          (B, dim, D, H, W)   -- NCDHW
    w_expand:   (dim, 4*dim)        -- PyTorch Linear(dim, 4*dim).weight.T
    ln_gamma:   (dim // 2,)
    ln_beta:    (dim // 2,)
    returns     (B, dim // 2, 2*D, 2*H, 2*W)
    """
    B, dim, D, H, W = x.shape
    assert (D, H, W) == tuple(input_resolution)
    assert dim % 2 == 0
    c = dim // 2
    c4 = 4 * dim
    out_dtype = x.dtype if out_dtype is None else out_dtype

    # x.flatten(2).transpose(1, 2) -> (B*D*H*W, dim) tokens; bf16 for the MXU.
    tokens = jnp.transpose(x, (0, 2, 3, 4, 1)).reshape(B * D * H * W, dim)
    tokens = tokens.astype(compute_dtype)
    w = w_expand.astype(compute_dtype)
    n = tokens.shape[0]

    vmem_limit, budget = _vmem_budget()
    tile = _choose_tile_n(
        n, dim, c4,
        tok_bytes=jnp.dtype(compute_dtype).itemsize,
        out_bytes=jnp.dtype(out_dtype).itemsize,
        budget=budget, requested=tile_n)
    n_pad = _round_up(n, tile)
    if n_pad != n:  # pad the tail tile instead of collapsing to one giant block
        tokens = jnp.pad(tokens, ((0, n_pad - n), (0, 0)))

    # LayerNorm affine params pre-tiled to the full 4*dim width (single VPU pass).
    gamma = jnp.tile(ln_gamma.astype(jnp.float32), 8).reshape(1, c4)
    beta = jnp.tile(ln_beta.astype(jnp.float32), 8).reshape(1, c4)
    # Group indicator matrices: expanded channel j belongs to group j // c.
    onehot = (jnp.arange(c4, dtype=jnp.int32)[:, None] // c
              == jnp.arange(8, dtype=jnp.int32)[None, :]).astype(jnp.float32)
    g_reduce = onehot / float(c)   # (4*dim, 8)
    g_bcast = onehot.T             # (8, 4*dim)

    call = functools.partial(
        _expand_call, tokens, w, gamma, beta, g_reduce, g_bcast,
        tile_n=tile, n_pad=n_pad, dim=dim, c4=c4, eps=eps,
        out_dtype=out_dtype, vmem_limit=vmem_limit)
    try:
        y = call(single_buffer_consts=True)
    except Exception:
        # Fallback for JAX versions without single-buffered pipeline_mode support.
        y = call(single_buffer_consts=False)

    if n_pad != n:
        y = y[:n]

    # rearrange 'b d h w (p1 p2 p3 c) -> b (d p1) (h p2) (w p3) c' fused with the
    # final .permute(0, 4, 1, 2, 3) into ONE transpose (one HBM copy pass, not two).
    # TODO(synk): the (p1,p2,p3) interleave into NCDHW is not expressible as a
    # rectangular output BlockSpec, so it remains this single fused XLA transpose.
    y = y.reshape(B, D, H, W, 2, 2, 2, c)
    y = jnp.transpose(y, (0, 7, 1, 4, 2, 5, 3, 6))
    return y.reshape(B, c, 2 * D, 2 * H, 2 * W)


def _reference(x, w_expand, ln_gamma, ln_beta, *, eps=1e-5,
               compute_dtype=jnp.bfloat16):
    B, dim, D, H, W = x.shape
    c = dim // 2
    t = jnp.transpose(x, (0, 2, 3, 4, 1)).reshape(B, D * H * W, dim)
    y = jnp.einsum("blc,cf->blf", t.astype(compute_dtype),
                   w_expand.astype(compute_dtype),
                   preferred_element_type=jnp.float32)
    y = y.reshape(B, D, H, W, 2, 2, 2, c)
    y = jnp.transpose(y, (0, 1, 4, 2, 5, 3, 6, 7)).reshape(B, 2 * D, 2 * H, 2 * W, c)
    mu = jnp.mean(y, axis=-1, keepdims=True)
    var = jnp.mean((y - mu) ** 2, axis=-1, keepdims=True)
    y = (y - mu) * jax.lax.rsqrt(var + eps) * ln_gamma + ln_beta
    return jnp.transpose(y, (0, 4, 1, 2, 3)).astype(x.dtype)


if __name__ == "__main__":
    B, dim = 2, 32
    D = H = W = 4
    c = dim // 2

    key = jax.random.PRNGKey(0)
    kx, kw, kg, kb = jax.random.split(key, 4)
    x = jax.random.normal(kx, (B, dim, D, H, W), dtype=jnp.float32)
    # PyTorch Linear(dim, 4*dim).weight has shape (4*dim, dim); store its
    # transpose so the kernel does a plain tokens @ W.
    w_expand = jax.random.normal(kw, (dim, 4 * dim), dtype=jnp.float32) * 0.05
    ln_gamma = 1.0 + 0.1 * jax.random.normal(kg, (c,), dtype=jnp.float32)
    ln_beta = 0.1 * jax.random.normal(kb, (c,), dtype=jnp.float32)

    out = patch_expanding(x, w_expand, ln_gamma, ln_beta,
                          input_resolution=(D, H, W))
    out = jax.block_until_ready(out)

    ref = _reference(x, w_expand, ln_gamma, ln_beta)
    assert out.shape == (B, c, 2 * D, 2 * H, 2 * W), out.shape
    assert jnp.allclose(out, ref, rtol=1e-2, atol=1e-2), float(
        jnp.max(jnp.abs(out - ref)))

    print("KERNEL_OK")
</pallas_src>

<mosaic_0001>
module attributes {stable_mosaic.version = 11 : i64} {
  func.func @_patch_expand_kernel(%arg0: i32, %arg1: memref<128x32xbf16, #tpu.memory_space<vmem>>, %arg2: memref<32x128xbf16, #tpu.memory_space<vmem>>, %arg3: memref<1x128xf32, #tpu.memory_space<vmem>>, %arg4: memref<1x128xf32, #tpu.memory_space<vmem>>, %arg5: memref<128x8xf32, #tpu.memory_space<vmem>>, %arg6: memref<8x128xf32, #tpu.memory_space<vmem>>, %arg7: memref<128x128xf32, #tpu.memory_space<vmem>>) attributes {dimension_semantics = [#tpu.dimension_semantics<parallel>], iteration_bounds = array<i64: 1>, scalar_prefetch = 0 : i64, scratch_operands = 0 : i64, tpu.core_type = #tpu.core_type<tc>, window_params = [{transform_indices = @transform_0, window_bounds = array<i64: 128, 32>}, {pipeline_mode = #tpu.pipeline_mode<synchronous>, transform_indices = @transform_1, window_bounds = array<i64: 32, 128>}, {pipeline_mode = #tpu.pipeline_mode<synchronous>, transform_indices = @transform_2, window_bounds = array<i64: 1, 128>}, {pipeline_mode = #tpu.pipeline_mode<synchronous>, transform_indices = @transform_3, window_bounds = array<i64: 1, 128>}, {pipeline_mode = #tpu.pipeline_mode<synchronous>, transform_indices = @transform_4, window_bounds = array<i64: 128, 8>}, {pipeline_mode = #tpu.pipeline_mode<synchronous>, transform_indices = @transform_5, window_bounds = array<i64: 8, 128>}, {transform_indices = @transform_6, window_bounds = array<i64: 128, 128>}]} {
    %c0 = arith.constant 0 : index
    %c0_0 = arith.constant 0 : index
    %0 = vector.load %arg1[%c0, %c0_0] : memref<128x32xbf16, #tpu.memory_space<vmem>>, vector<128x32xbf16>
    %c0_1 = arith.constant 0 : index
    %c0_2 = arith.constant 0 : index
    %1 = vector.load %arg2[%c0_1, %c0_2] : memref<32x128xbf16, #tpu.memory_space<vmem>>, vector<32x128xbf16>
    %cst = arith.constant dense<0.000000e+00> : vector<128x128xf32>
    %2 = tpu.matmul %0, %1, %cst {dimension_numbers = #tpu.dot_dimension_numbers<[1], [0], [0], [1], [0, 0, 1, 1], [], []>} : vector<128x32xbf16>, vector<32x128xbf16>, vector<128x128xf32> -> vector<128x128xf32>
    %c0_3 = arith.constant 0 : index
    %c0_4 = arith.constant 0 : index
    %3 = vector.load %arg5[%c0_3, %c0_4] : memref<128x8xf32, #tpu.memory_space<vmem>>, vector<128x8xf32>
    %c0_5 = arith.constant 0 : index
    %c0_6 = arith.constant 0 : index
    %4 = vector.load %arg6[%c0_5, %c0_6] : memref<8x128xf32, #tpu.memory_space<vmem>>, vector<8x128xf32>
    %cst_7 = arith.constant dense<0.000000e+00> : vector<128x8xf32>
    %5 = tpu.matmul %2, %3, %cst_7 {dimension_numbers = #tpu.dot_dimension_numbers<[1], [0], [0], [1], [0, 0, 1, 1], [], []>} : vector<128x128xf32>, vector<128x8xf32>, vector<128x8xf32> -> vector<128x8xf32>
    %6 = arith.mulf %2, %2 : vector<128x128xf32>
    %cst_8 = arith.constant dense<0.000000e+00> : vector<128x8xf32>
    %7 = tpu.matmul %6, %3, %cst_8 {dimension_numbers = #tpu.dot_dimension_numbers<[1], [0], [0], [1], [0, 0, 1, 1], [], []>} : vector<128x128xf32>, vector<128x8xf32>, vector<128x8xf32> -> vector<128x8xf32>
    %8 = arith.mulf %5, %5 : vector<128x8xf32>
    %9 = arith.subf %7, %8 : vector<128x8xf32>
    %cst_9 = arith.constant 0.000000e+00 : f32
    %10 = vector.broadcast %cst_9 : f32 to vector<128x8xf32>
    %11 = arith.maximumf %9, %10 : vector<128x8xf32>
    %cst_10 = arith.constant 9.99999974E-6 : f32
    %12 = vector.broadcast %cst_10 : f32 to vector<128x8xf32>
    %13 = arith.addf %11, %12 : vector<128x8xf32>
    %14 = math.rsqrt %13 : vector<128x8xf32>
    %cst_11 = arith.constant dense<0.000000e+00> : vector<128x128xf32>
    %15 = tpu.matmul %5, %4, %cst_11 {dimension_numbers = #tpu.dot_dimension_numbers<[1], [0], [0], [1], [0, 0, 1, 1], [], []>} : vector<128x8xf32>, vector<8x128xf32>, vector<128x128xf32> -> vector<128x128xf32>
    %cst_12 = arith.constant dense<0.000000e+00> : vector<128x128xf32>
    %16 = tpu.matmul %14, %4, %cst_12 {dimension_numbers = #tpu.dot_dimension_numbers<[1], [0], [0], [1], [0, 0, 1, 1], [], []>} : vector<128x8xf32>, vector<8x128xf32>, vector<128x128xf32> -> vector<128x128xf32>
    %17 = arith.subf %2, %15 : vector<128x128xf32>
    %18 = arith.mulf %17, %16 : vector<128x128xf32>
    %c0_13 = arith.constant 0 : index
    %c0_14 = arith.constant 0 : index
    %19 = vector.load %arg3[%c0_13, %c0_14] : memref<1x128xf32, #tpu.memory_space<vmem>>, vector<1x128xf32>
    %20 = vector.broadcast %19 : vector<1x128xf32> to vector<128x128xf32>
    %21 = arith.mulf %18, %20 : vector<128x128xf32>
    %c0_15 = arith.constant 0 : index
    %c0_16 = arith.constant 0 : index
    %22 = vector.load %arg4[%c0_15, %c0_16] : memref<1x128xf32, #tpu.memory_space<vmem>>, vector<1x128xf32>
    %23 = vector.broadcast %22 : vector<1x128xf32> to vector<128x128xf32>
    %24 = arith.addf %21, %23 : vector<128x128xf32>
    %c0_17 = arith.constant 0 : index
    %c0_18 = arith.constant 0 : index
    %25 = vector.load %arg7[%c0_17, %c0_18] : memref<128x128xf32, #tpu.memory_space<vmem>>, vector<128x128xf32>
    tpu.vector_store %arg7[%c0_17, %c0_18], %24 {strides = array<i32>} : memref<128x128xf32, #tpu.memory_space<vmem>>, vector<128x128xf32>,
    return
  }
  func.func @transform_0(%arg0: i32) -> (i32, i32) {
    %c0_i32 = arith.constant 0 : i32
    %c0_i32_0 = arith.constant 0 : i32
    return %arg0, %c0_i32 : i32, i32
  }
  func.func @transform_1(%arg0: i32) -> (i32, i32) {
    %c0_i32 = arith.constant 0 : i32
    %c0_i32_0 = arith.constant 0 : i32
    %c0_i32_1 = arith.constant 0 : i32
    return %c0_i32, %c0_i32_0 : i32, i32
  }
  func.func @transform_2(%arg0: i32) -> (i32, i32) {
    %c0_i32 = arith.constant 0 : i32
    %c0_i32_0 = arith.constant 0 : i32
    %c0_i32_1 = arith.constant 0 : i32
    return %c0_i32, %c0_i32_0 : i32, i32
  }
  func.func @transform_3(%arg0: i32) -> (i32, i32) {
    %c0_i32 = arith.constant 0 : i32
    %c0_i32_0 = arith.constant 0 : i32
    %c0_i32_1 = arith.constant 0 : i32
    return %c0_i32, %c0_i32_0 : i32, i32
  }
  func.func @transform_4(%arg0: i32) -> (i32, i32) {
    %c0_i32 = arith.constant 0 : i32
    %c0_i32_0 = arith.constant 0 : i32
    %c0_i32_1 = arith.constant 0 : i32
    return %c0_i32, %c0_i32_0 : i32, i32
  }
  func.func @transform_5(%arg0: i32) -> (i32, i32) {
    %c0_i32 = arith.constant 0 : i32
    %c0_i32_0 = arith.constant 0 : i32
    %c0_i32_1 = arith.constant 0 : i32
    return %c0_i32, %c0_i32_0 : i32, i32
  }
  func.func @transform_6(%arg0: i32) -> (i32, i32) {
    %c0_i32 = arith.constant 0 : i32
    %c0_i32_0 = arith.constant 0 : i32
    return %arg0, %c0_i32 : i32, i32
  }
}

module attributes {stable_mosaic.version = 11 : i64} {
  func.func @_patch_expand_kernel(%arg0: i32, %arg1: memref<128x32xbf16, #tpu.memory_space<vmem>>, %arg2: memref<32x128xbf16, #tpu.memory_space<vmem>>, %arg3: memref<1x128xf32, #tpu.memory_space<vmem>>, %arg4: memref<1x128xf32, #tpu.memory_space<vmem>>, %arg5: memref<128x8xf32, #tpu.memory_space<vmem>>, %arg6: memref<8x128xf32, #tpu.memory_space<vmem>>, %arg7: memref<128x128xf32, #tpu.memory_space<vmem>>) attributes {dimension_semantics = [#tpu.dimension_semantics<parallel>], iteration_bounds = array<i64: 1>, scalar_prefetch = 0 : i64, scratch_operands = 0 : i64, tpu.core_type = #tpu.core_type<tc>, window_params = [{transform_indices = @transform_0, window_bounds = array<i64: 128, 32>}, {pipeline_mode = #tpu.pipeline_mode<synchronous>, transform_indices = @transform_1, window_bounds = array<i64: 32, 128>}, {pipeline_mode = #tpu.pipeline_mode<synchronous>, transform_indices = @transform_2, window_bounds = array<i64: 1, 128>}, {pipeline_mode = #tpu.pipeline_mode<synchronous>, transform_indices = @transform_3, window_bounds = array<i64: 1, 128>}, {pipeline_mode = #tpu.pipeline_mode<synchronous>, transform_indices = @transform_4, window_bounds = array<i64: 128, 8>}, {pipeline_mode = #tpu.pipeline_mode<synchronous>, transform_indices = @transform_5, window_bounds = array<i64: 8, 128>}, {transform_indices = @transform_6, window_bounds = array<i64: 128, 128>}]} {
    %c0 = arith.constant 0 : index
    %c0_0 = arith.constant 0 : index
    %0 = vector.load %arg1[%c0, %c0_0] : memref<128x32xbf16, #tpu.memory_space<vmem>>, vector<128x32xbf16>
    %c0_1 = arith.constant 0 : index
    %c0_2 = arith.constant 0 : index
    %1 = vector.load %arg2[%c0_1, %c0_2] : memref<32x128xbf16, #tpu.memory_space<vmem>>, vector<32x128xbf16>
    %cst = arith.constant dense<0.000000e+00> : vector<128x128xf32>
    %2 = tpu.matmul %0, %1, %cst {dimension_numbers = #tpu.dot_dimension_numbers<[1], [0], [0], [1], [0, 0, 1, 1], [], []>} : vector<128x32xbf16>, vector<32x128xbf16>, vector<128x128xf32> -> vector<128x128xf32>
    %c0_3 = arith.constant 0 : index
    %c0_4 = arith.constant 0 : index
    %3 = vector.load %arg5[%c0_3, %c0_4] : memref<128x8xf32, #tpu.memory_space<vmem>>, vector<128x8xf32>
    %c0_5 = arith.constant 0 : index
    %c0_6 = arith.constant 0 : index
    %4 = vector.load %arg6[%c0_5, %c0_6] : memref<8x128xf32, #tpu.memory_space<vmem>>, vector<8x128xf32>
    %cst_7 = arith.constant dense<0.000000e+00> : vector<128x8xf32>
    %5 = tpu.matmul %2, %3, %cst_7 {dimension_numbers = #tpu.dot_dimension_numbers<[1], [0], [0], [1], [0, 0, 1, 1], [], []>} : vector<128x128xf32>, vector<128x8xf32>, vector<128x8xf32> -> vector<128x8xf32>
    %6 = arith.mulf %2, %2 : vector<128x128xf32>
    %cst_8 = arith.constant dense<0.000000e+00> : vector<128x8xf32>
    %7 = tpu.matmul %6, %3, %cst_8 {dimension_numbers = #tpu.dot_dimension_numbers<[1], [0], [0], [1], [0, 0, 1, 1], [], []>} : vector<128x128xf32>, vector<128x8xf32>, vector<128x8xf32> -> vector<128x8xf32>
    %8 = arith.mulf %5, %5 : vector<128x8xf32>
    %9 = arith.subf %7, %8 : vector<128x8xf32>
    %cst_9 = arith.constant 0.000000e+00 : f32
    %10 = vector.broadcast %cst_9 : f32 to vector<128x8xf32>
    %11 = arith.maximumf %9, %10 : vector<128x8xf32>
    %cst_10 = arith.constant 9.99999974E-6 : f32
    %12 = vector.broadcast %cst_10 : f32 to vector<128x8xf32>
    %13 = arith.addf %11, %12 : vector<128x8xf32>
    %14 = math.rsqrt %13 : vector<128x8xf32>
    %cst_11 = arith.constant dense<0.000000e+00> : vector<128x128xf32>
    %15 = tpu.matmul %5, %4, %cst_11 {dimension_numbers = #tpu.dot_dimension_numbers<[1], [0], [0], [1], [0, 0, 1, 1], [], []>} : vector<128x8xf32>, vector<8x128xf32>, vector<128x128xf32> -> vector<128x128xf32>
    %cst_12 = arith.constant dense<0.000000e+00> : vector<128x128xf32>
    %16 = tpu.matmul %14, %4, %cst_12 {dimension_numbers = #tpu.dot_dimension_numbers<[1], [0], [0], [1], [0, 0, 1, 1], [], []>} : vector<128x8xf32>, vector<8x128xf32>, vector<128x128xf32> -> vector<128x128xf32>
    %17 = arith.subf %2, %15 : vector<128x128xf32>
    %18 = arith.mulf %17, %16 : vector<128x128xf32>
    %c0_13 = arith.constant 0 : index
    %c0_14 = arith.constant 0 : index
    %19 = vector.load %arg3[%c0_13, %c0_14] : memref<1x128xf32, #tpu.memory_space<vmem>>, vector<1x128xf32>
    %20 = vector.broadcast %19 : vector<1x128xf32> to vector<128x128xf32>
    %21 = arith.mulf %18, %20 : vector<128x128xf32>
    %c0_15 = arith.constant 0 : index
    %c0_16 = arith.constant 0 : index
    %22 = vector.load %arg4[%c0_15, %c0_16] : memref<1x128xf32, #tpu.memory_space<vmem>>, vector<1x128xf32>
    %23 = vector.broadcast %22 : vector<1x128xf32> to vector<128x128xf32>
    %24 = arith.addf %21, %23 : vector<128x128xf32>
    %c0_17 = arith.constant 0 : index
    %c0_18 = arith.constant 0 : index
    %25 = vector.load %arg7[%c0_17, %c0_18] : memref<128x128xf32, #tpu.memory_space<vmem>>, vector<128x128xf32>
    tpu.vector_store %arg7[%c0_17, %c0_18], %24 {strides = array<i32>} : memref<128x128xf32, #tpu.memory_space<vmem>>, vector<128x128xf32>,
    return
  }
  func.func @transform_0(%arg0: i32) -> (i32, i32) {
    %c0_i32 = arith.constant 0 : i32
    %c0_i32_0 = arith.constant 0 : i32
    return %arg0, %c0_i32 : i32, i32
  }
  func.func @transform_1(%arg0: i32) -> (i32, i32) {
    %c0_i32 = arith.constant 0 : i32
    %c0_i32_0 = arith.constant 0 : i32
    %c0_i32_1 = arith.constant 0 : i32
    return %c0_i32, %c0_i32_0 : i32, i32
  }
  func.func @transform_2(%arg0: i32) -> (i32, i32) {
    %c0_i32 = arith.constant 0 : i32
    %c0_i32_0 = arith.constant 0 : i32
    %c0_i32_1 = arith.constant 0 : i32
    return %c0_i32, %c0_i32_0 : i32, i32
  }
  func.func @transform_3(%arg0: i32) -> (i32, i32) {
    %c0_i32 = arith.constant 0 : i32
    %c0_i32_0 = arith.constant 0 : i32
    %c0_i32_1 = arith.constant 0 : i32
    return %c0_i32, %c0_i32_0 : i32, i32
  }
  func.func @transform_4(%arg0: i32) -> (i32, i32) {
    %c0_i32 = arith.constant 0 : i32
    %c0_i32_0 = arith.constant 0 : i32
    %c0_i32_1 = arith.constant 0 : i32
    return %c0_i32, %c0_i32_0 : i32, i32
  }
  func.func @transform_5(%arg0: i32) -> (i32, i32) {
    %c0_i32 = arith.constant 0 : i32
    %c0_i32_0 = arith.constant 0 : i32
    %c0_i32_1 = arith.constant 0 : i32
    return %c0_i32, %c0_i32_0 : i32, i32
  }
  func.func @transform_6(%arg0: i32) -> (i32, i32) {
    %c0_i32 = arith.constant 0 : i32
    %c0_i32_0 = arith.constant 0 : i32
    return %arg0, %c0_i32 : i32, i32
  }
}

</mosaic_0001>

<bundles_post_ra>
// kernel: tpu_custom_call.1
= control target key start
LH: loop header
LB: loop body
LE: loop exit
PB: predicated region body
PF: predicated region fallthrough
CT: control target
= control target key end

     0   :  { %vm97_vm0 = vcmask 261120   ;;  %s1991_s0 = inlined_call_operand.vmem [shape: bf16[128,32], index: 0, kind: input, shape index: {}]   ;;  %s1992_s1 = inlined_call_operand.vmem [shape: bf16[32,128], index: 1, kind: input, shape index: {}]   ;;  %s1993_s2 = inlined_call_operand.vmem [shape: f32[1,128], index: 2, kind: input, shape index: {}]   ;;  %s1994_s3 = inlined_call_operand.vmem [shape: f32[1,128], index: 3, kind: input, shape index: {}]   ;;  %s1995_s4 = inlined_call_operand.vmem [shape: f32[128,8], index: 4, kind: input, shape index: {}]   ;;  %s1996_s5 = inlined_call_operand.vmem [shape: f32[8,128], index: 5, kind: input, shape index: {}]   ;;  %s1997_s6 = inlined_call_operand.hbm [shape: f32[128,128], index: 6, kind: output, shape index: {}]  }
   0x1   :  { %v1546_v0 = vld [vmem:[%s1992_s1] sm:$0xff]   ;;  %v1547_v1 = vld [vmem:[%s1992_s1 + $0x8] sm:$0xff]   ;;  %v1550_v4 = vld [vmem:[%s1991_s0 + $0x10] sm:$0xff]  }
   0x2   :  { %1279 = vmatprep.subr.bf16.mxu0 %v1546_v0  ;;  %v1548_v2 = vld [vmem:[%s1991_s0] sm:$0xff]   ;;  %v1549_v3 = vld [vmem:[%s1991_s0 + $0x8] sm:$0xff]   ;;  %v221_v7 = vld [vmem:[%s1995_s4 + $0x10] sm:$0xff] }
   0x3   :  { %1280 = vmatpush3.bf16.msra.mxu0 %v1546_v0  ;;  %1283 = vmatprep.mubr.msk.bf16.mxu0 %vm97_vm0, %v1548_v2  ;;  %v219_v5 = vld [vmem:[%s1995_s4] sm:$0xff]  ;;  %v220_v6 = vld [vmem:[%s1995_s4 + $0x8] sm:$0xff]  ;;  %v222_v9 = vld [vmem:[%s1995_s4 + $0x18] sm:$0xff] }
   0x4   :  { %1281 = vmatprep.subr.bf16.mxu0 %v1547_v1  ;;  %v1677_v8 = vpack.c.bf16 %v220_v6, %v219_v5  ;;  %v1682_v10 = vpack.c.bf16 %v222_v9, %v221_v7  ;;  %v223_v11 = vld [vmem:[%s1995_s4 + $0x20] sm:$0xff]  ;;  %v224_v12 = vld [vmem:[%s1995_s4 + $0x28] sm:$0xff]  ;;  %v1551_v13 = vld [vmem:[%s1991_s0 + $0x18] sm:$0xff]  }
   0x5   :  { %v1552_v14 = vld [vmem:[%s1991_s0 + $0x20] sm:$0xff]   ;;  %v1702_v15 = vpack.c.bf16 %v224_v12, %v223_v11 }
   0x6   :  { %1464 = vmatprep.subr.bf16.mxu1 %v1677_v8 }
   0x7   :  { %1282 = vmatpush3.bf16.msra.mxu0 %v1547_v1  ;;  %1466 = vmatpush3.bf16.msra.mxu1 %v1677_v8 }
   0x8   :  { %1496 = vmatprep.subr.bf16.mxu0 %v1677_v8  ;;  %1468 = vmatprep.subr.bf16.mxu1 %v1682_v10 }
   0xa   :  { %1284 = vmatmul.mubr.msk.bf16.vlgmr.msra.gmra.mrb[0].mxu0 %vm97_vm0, %v1549_v3 }
   0xb   :  { %1287 = vmatprep.mubr.msk.bf16.mxu0 %vm97_vm0, %v1550_v4  ;;  %1498 = vmatpush3.bf16.msra.mxu0 %v1677_v8 }
   0xc   :  { %1500 = vmatprep.subr.bf16.mxu0 %v1682_v10 }
   0xd   :  { %11 = vsyncpa [#allocation3], 0  ;;  %v225_v16 = vld [vmem:[%s1995_s4 + $0x30] sm:$0xff]  ;;  %v226_v17 = vld [vmem:[%s1995_s4 + $0x38] sm:$0xff]  ;;  %1470 = vmatpush3.bf16.msra.mxu1 %v1682_v10  ;;  %vm622_vm1 = vcmask 64512  }
   0xe   :  { %1472 = vmatprep.subr.bf16.mxu1 %v1702_v15  ;;  %v1714_v18 = vpack.c.bf16 %v226_v17, %v225_v16  ;;  %v227_v19 = vld [vmem:[%s1995_s4 + $0x40] sm:$0xff]  ;;  %v228_v20 = vld [vmem:[%s1995_s4 + $0x48] sm:$0xff]  ;;  %v1554_v22 = vld [vmem:[%s1991_s0 + $0x30] sm:$0xff]  }
   0xf   :  { %1502 = vmatpush3.bf16.msra.mxu0 %v1682_v10  ;;  %v1553_v21 = vld [vmem:[%s1991_s0 + $0x28] sm:$0xff]   ;;  %v1732_v23 = vpack.c.bf16 %v228_v20, %v227_v19  ;;  %v229_v24 = vld [vmem:[%s1995_s4 + $0x50] sm:$0xff]  ;;  %v230_v25 = vld [vmem:[%s1995_s4 + $0x58] sm:$0xff] }
  0x10   :  { %1504 = vmatprep.subr.bf16.mxu0 %v1702_v15  ;;  %v1746_v26 = vpack.c.bf16 %v230_v25, %v229_v24  ;;  %v231_v27 = vld [vmem:[%s1995_s4 + $0x60] sm:$0xff]  ;;  %v232_v28 = vld [vmem:[%s1995_s4 + $0x68] sm:$0xff]  ;;  %v1555_v29 = vld [vmem:[%s1991_s0 + $0x38] sm:$0xff]  }
  0x11   :  { %1474 = vmatpush3.bf16.msra.mxu1 %v1702_v15  ;;  %v1761_v30 = vpack.c.bf16 %v232_v28, %v231_v27  ;;  %v233_v31 = vld [vmem:[%s1995_s4 + $0x70] sm:$0xff]  ;;  %v234_v32 = vld [vmem:[%s1995_s4 + $0x78] sm:$0xff]  ;;  %v1788_v34 = vld [vmem:[%s1996_s5] sm:$0xff] }
  0x12   :  { %1288 = vmatmul.mubr.msk.bf16.gmra.mrb[4].mxu0 %vm97_vm0, %v1551_v13  ;;  %1476 = vmatprep.subr.bf16.mxu1 %v1714_v18  ;;  %v1774_v33 = vpack.c.bf16 %v234_v32, %v233_v31 }
  0x13   :  { %1291 = vmatprep.mubr.msk.bf16.mxu0 %vm97_vm0, %v1552_v14  ;;  %1506 = vmatpush3.bf16.msra.mxu0 %v1702_v15 }
  0x14   :  { %1508 = vmatprep.subr.bf16.mxu0 %v1714_v18 }
  0x15   :  { %1478 = vmatpush3.bf16.msra.mxu1 %v1714_v18 }
  0x16   :  { %1480 = vmatprep.subr.bf16.mxu1 %v1732_v23 }
  0x17   :  { %1510 = vmatpush3.bf16.msra.mxu0 %v1714_v18 }
  0x18   :  { %1512 = vmatprep.subr.bf16.mxu0 %v1732_v23 }
  0x19   :  { %1482 = vmatpush3.bf16.msra.mxu1 %v1732_v23 }
  0x1a   :  { %1292 = vmatmul.mubr.msk.bf16.gmra.mrb[8].mxu0 %vm97_vm0, %v1553_v21  ;;  %1484 = vmatprep.subr.bf16.mxu1 %v1746_v26 }
  0x1b   :  { %1295 = vmatprep.mubr.msk.bf16.mxu0 %vm97_vm0, %v1554_v22  ;;  %1514 = vmatpush3.bf16.msra.mxu0 %v1732_v23 }
  0x1c   :  { %1516 = vmatprep.subr.bf16.mxu0 %v1746_v26 }
  0x1d   :  { %1486 = vmatpush3.bf16.msra.mxu1 %v1746_v26 }
  0x1e   :  { %1488 = vmatprep.subr.bf16.mxu1 %v1761_v30 }
  0x1f   :  { %1518 = vmatpush3.bf16.msra.mxu0 %v1746_v26 }
  0x20   :  { %1520 = vmatprep.subr.bf16.mxu0 %v1761_v30 }
  0x21   :  { %1490 = vmatpush3.bf16.msra.mxu1 %v1761_v30 }
  0x22   :  { %1296 = vmatmul.mubr.msk.bf16.gmra.mrb[12].mxu0 %vm97_vm0, %v1555_v29  ;;  %1492 = vmatprep.subr.bf16.mxu1 %v1774_v33 }
  0x23   :  { %1522 = vmatpush3.bf16.msra.mxu0 %v1761_v30 }
  0x24   :  { %1524 = vmatprep.subr.bf16.mxu0 %v1774_v33 }
  0x25   :  { %1494 = vmatpush3.bf16.msra.mxu1 %v1774_v33 }
  0x26   :  { %1527 = vmatprep.subr.bf16.mxu1 %v1677_v8 }
  0x27   :  { %1526 = vmatpush3.bf16.msra.mxu0 %v1774_v33 }
  0x28   :  { %1437 = vmatprep.subr.mxu0 %v1788_v34 }
  0xdd   :  { %v1791_v35 = vpop.f32.mrb[0].mxu0 }
  0xde   :  { %v1793_v36 = vpop.f32.mrb[1].mxu0  ;;  %v383_v41 = vmul.f32 %v1791_v35, %v1791_v35 }
  0xdf   :  { %v381_v37 = vmul.f32 %v1793_v36, %v1793_v36  ;;  %v1797_v38 = vpop.f32.mrb[2].mxu0  ;;  %1331 = vmatprep.mubr.f32.mxu1 %v1793_v36 }
  0xe0   :  { %v1800_v39 = vpop.f32.mrb[3].mxu0  ;;  %v384_v42 = vmul.f32 %v1797_v38, %v1797_v38 }
  0xe1   :  { %v382_v40 = vmul.f32 %v1800_v39, %v1800_v39  ;;  %1332 = vmatmul.mubr.f32.vlgmr.msra.gmra.mrb[0].mxu1 %v1800_v39  ;;  %1387 = vmatprep.mubr.f32.mxu0 %v381_v37 }
  0xe2   :  { %1535 = vmatpush3.bf16.msra.mxu1 %v1677_v8  ;;  %1334 = vmatprep.mubr.f32.mxu1 %v1791_v35 }
  0xe3   :  { %1388 = vmatmul.mubr.f32.vlgmr.msra.gmra.mrb[16].mxu0 %v382_v40  ;;  %1528 = vmatprep.subr.bf16.mxu1 %v1682_v10 }
  0xe4   :  { %1390 = vmatprep.mubr.f32.mxu0 %v383_v41  ;;  %1438 = vmatpush3.msra.mxu0 %v1788_v34 }
  0xe5   :  { %v1813_v43 = vpop.f32.mrb[4].mxu0  ;;  %1335 = vmatmul.mubr.f32.gmra.mrb[2].mxu1 %v1797_v38 }
  0xe6   :  { %1536 = vmatpush3.bf16.msra.mxu1 %v1682_v10  ;;  %v1817_v44 = vpop.f32.mrb[5].mxu0  ;;  %v387_v49 = vmul.f32 %v1813_v43, %v1813_v43 }
  0xe7   :  { %v385_v45 = vmul.f32 %v1817_v44, %v1817_v44  ;;  %v1821_v46 = vpop.f32.mrb[6].mxu0  ;;  %1337 = vmatprep.mubr.f32.mxu1 %v1817_v44  ;;  %1391 = vmatmul.mubr.f32.gmra.mrb[18].mxu0 %v384_v42 }
  0xe8   :  { %v1824_v47 = vpop.f32.mrb[7].mxu0  ;;  %1529 = vmatprep.subr.bf16.mxu1 %v1702_v15  ;;  %v388_v50 = vmul.f32 %v1821_v46, %v1821_v46 }
  0xe9   :  { %v386_v48 = vmul.f32 %v1824_v47, %v1824_v47  ;;  %1338 = vmatmul.mubr.f32.gmra.mrb[4].mxu1 %v1824_v47  ;;  %1393 = vmatprep.mubr.f32.mxu0 %v385_v45 }
  0xea   :  { %1537 = vmatpush3.bf16.msra.mxu1 %v1702_v15  ;;  %1340 = vmatprep.mubr.f32.mxu1 %v1813_v43 }
  0xeb   :  { %1394 = vmatmul.mubr.f32.gmra.mrb[20].mxu0 %v386_v48  ;;  %1530 = vmatprep.subr.bf16.mxu1 %v1714_v18 }
  0xec   :  { %1396 = vmatprep.mubr.f32.mxu0 %v387_v49 }
  0xed   :  { %v1837_v51 = vpop.f32.mrb[8].mxu0  ;;  %1341 = vmatmul.mubr.f32.gmra.mrb[6].mxu1 %v1821_v46 }
  0xee   :  { %1538 = vmatpush3.bf16.msra.mxu1 %v1714_v18  ;;  %v1841_v52 = vpop.f32.mrb[9].mxu0  ;;  %v391_v57 = vmul.f32 %v1837_v51, %v1837_v51 }
  0xef   :  { %v389_v53 = vmul.f32 %v1841_v52, %v1841_v52  ;;  %v1845_v54 = vpop.f32.mrb[10].mxu0  ;;  %1343 = vmatprep.mubr.f32.mxu1 %v1841_v52  ;;  %1397 = vmatmul.mubr.f32.gmra.mrb[22].mxu0 %v388_v50 }
  0xf0   :  { %v1848_v55 = vpop.f32.mrb[11].mxu0  ;;  %1531 = vmatprep.subr.bf16.mxu1 %v1732_v23  ;;  %v392_v58 = vmul.f32 %v1845_v54, %v1845_v54 }
  0xf1   :  { %v390_v56 = vmul.f32 %v1848_v55, %v1848_v55  ;;  %1344 = vmatmul.mubr.f32.gmra.mrb[8].mxu1 %v1848_v55  ;;  %1399 = vmatprep.mubr.f32.mxu0 %v389_v53 }
  0xf2   :  { %1539 = vmatpush3.bf16.msra.mxu1 %v1732_v23  ;;  %1346 = vmatprep.mubr.f32.mxu1 %v1837_v51 }
  0xf3   :  { %1400 = vmatmul.mubr.f32.gmra.mrb[24].mxu0 %v390_v56  ;;  %1532 = vmatprep.subr.bf16.mxu1 %v1746_v26 }
  0xf4   :  { %1402 = vmatprep.mubr.f32.mxu0 %v391_v57 }
  0xf5   :  { %v1861_v59 = vpop.f32.mrb[12].mxu0  ;;  %1347 = vmatmul.mubr.f32.gmra.mrb[10].mxu1 %v1845_v54 }
  0xf6   :  { %1540 = vmatpush3.bf16.msra.mxu1 %v1746_v26  ;;  %v1865_v60 = vpop.f32.mrb[13].mxu0  ;;  %v395_v1 = vmul.f32 %v1861_v59, %v1861_v59 }
  0xf7   :  { %v393_v61 = vmul.f32 %v1865_v60, %v1865_v60  ;;  %v1869_v62 = vpop.f32.mrb[14].mxu0  ;;  %1349 = vmatprep.mubr.f32.mxu1 %v1865_v60  ;;  %1403 = vmatmul.mubr.f32.gmra.mrb[26].mxu0 %v392_v58 }
  0xf8   :  { %v1872_v63 = vpop.f32.mrb[15].mxu0  ;;  %1533 = vmatprep.subr.bf16.mxu1 %v1761_v30  ;;  %v396_v2 = vmul.f32 %v1869_v62, %v1869_v62 }
  0xf9   :  { %v394_v0 = vmul.f32 %v1872_v63, %v1872_v63  ;;  %1350 = vmatmul.mubr.f32.gmra.mrb[12].mxu1 %v1872_v63  ;;  %1405 = vmatprep.mubr.f32.mxu0 %v393_v61 }
  0xfa   :  { %1541 = vmatpush3.bf16.msra.mxu1 %v1761_v30  ;;  %1352 = vmatprep.mubr.f32.mxu1 %v1861_v59 }
  0xfb   :  { %1406 = vmatmul.mubr.f32.gmra.mrb[28].mxu0 %v394_v0  ;;  %1534 = vmatprep.subr.bf16.mxu1 %v1774_v33 }
  0xfd   :  { %1353 = vmatmul.mubr.f32.gmra.mrb[14].mxu1 %v1869_v62 }
  0xfe   :  { %1542 = vmatpush3.bf16.msra.mxu1 %v1774_v33  ;;  %1408 = vmatprep.mubr.f32.mxu1 %v395_v1 }
  0xff   :  { %1411 = vmatprep.subr.mxu1 %v1788_v34 }
 0x101   :  { %1409 = vmatmul.mubr.f32.vlgmr.msra.gmra.mrb[16].mxu1 %v396_v2 }
 0x102   :  { %1412 = vmatpush3.msra.mxu1 %v1788_v34 }
 0x1b4   :  { %v1333_v3 = vpop.f32.mrb[0].mxu1 }
 0x1b5   :  { %v543_v4 = vmul.f32 %v1333_v3, %v1333_v3  ;;  %v302_v5 = vpop.f32.mrb[1].mxu1 }
 0x1b6   :  { %v542_v6 = vmul.f32 %v302_v5, %v302_v5  ;;  %v1389_v7 = vpop.f32.mrb[16].mxu0  ;;  %1413 = vmatprep.mubr.msk.f32.mxu1 %vm622_vm1, %v302_v5 }
 0x1b7   :  { %v559_v8 = vsub.f32 %v1389_v7, %v543_v4  ;;  %v463_v9 = vpop.f32.mrb[17].mxu0  ;;  %1414 = vmatmul.mubr.msk.f32.vlgmr.msra.gmra.mrb[18].mxu1 %vm622_vm1, %v1333_v3 }
 0x1b8   :  { %v558_v10 = vsub.f32 %v463_v9, %v542_v6  ;;  %v1336_v11 = vpop.f32.mrb[2].mxu1 }
 0x1b9   :  { %v575_v12 = vmax.f32 %v559_v8, 0.0  ;;  %v545_v13 = vmul.f32 %v1336_v11, %v1336_v11  ;;  %v312_v14 = vpop.f32.mrb[3].mxu1 }
 0x1ba   :  { %v574_v15 = vmax.f32 %v558_v10, 0.0  ;;  %v544_v16 = vmul.f32 %v312_v14, %v312_v14  ;;  %v1392_v17 = vpop.f32.mrb[18].mxu0  ;;  %1416 = vmatprep.mubr.msk.f32.mxu1 %vm622_vm1, %v312_v14 }
 0x1bb   :  { %v591_v18 = vadd.f32 1e-05, %v575_v12  ;;  %v561_v19 = vsub.f32 %v1392_v17, %v545_v13  ;;  %v473_v20 = vpop.f32.mrb[19].mxu0  ;;  %1417 = vmatmul.mubr.msk.f32.gmra.mrb[20].mxu1 %vm622_vm1, %v1336_v11 }
 0x1bc   :  { %v590_v21 = vadd.f32 1e-05, %v574_v15  ;;  %v560_v22 = vsub.f32 %v473_v20, %v544_v16  ;;  %v1339_v23 = vpop.f32.mrb[4].mxu1 }
 0x1bd   :  { %v577_v24 = vmax.f32 %v561_v19, 0.0  ;;  %v547_v25 = vmul.f32 %v1339_v23, %v1339_v23  ;;  %v322_v26 = vpop.f32.mrb[5].mxu1 }
 0x1be   :  { %1556 = vrsqrt.f32 %v590_v21  ;;  %v576_v27 = vmax.f32 %v560_v22, 0.0  ;;  %v546_v28 = vmul.f32 %v322_v26, %v322_v26  ;;  %v1395_v29 = vpop.f32.mrb[20].mxu0  ;;  %1419 = vmatprep.mubr.msk.f32.mxu1 %vm622_vm1, %v322_v26 }
 0x1bf   :  { %1558 = vrsqrt.f32 %v591_v18  ;;  %v593_v30 = vadd.f32 1e-05, %v577_v24  ;;  %v563_v31 = vsub.f32 %v1395_v29, %v547_v25  ;;  %v483_v32 = vpop.f32.mrb[21].mxu0  ;;  %1420 = vmatmul.mubr.msk.f32.gmra.mrb[22].mxu1 %vm622_vm1, %v1339_v23 }
 0x1c0   :  { %v592_v33 = vadd.f32 1e-05, %v576_v27  ;;  %v562_v34 = vsub.f32 %v483_v32, %v546_v28  ;;  %v1342_v37 = vpop.f32.mrb[6].mxu1 }
 0x1c1   :  { %v579_v40 = vmax.f32 %v563_v31, 0.0  ;;  %v549_v41 = vmul.f32 %v1342_v37, %v1342_v37  ;;  %v332_v42 = vpop.f32.mrb[7].mxu1 }
 0x1c2   :  { %1560 = vrsqrt.f32 %v592_v33  ;;  %v578_v45 = vmax.f32 %v562_v34, 0.0  ;;  %v548_v48 = vmul.f32 %v332_v42, %v332_v42  ;;  %v1398_v49 = vpop.f32.mrb[22].mxu0  ;;  %1422 = vmatprep.mubr.msk.f32.mxu1 %vm622_vm1, %v332_v42 }
 0x1c3   :  { %1562 = vrsqrt.f32 %v593_v30  ;;  %v595_v50 = vadd.f32 1e-05, %v579_v40  ;;  %v565_v53 = vsub.f32 %v1398_v49, %v549_v41  ;;  %v493_v56 = vpop.f32.mrb[23].mxu0  ;;  %1423 = vmatmul.mubr.msk.f32.gmra.mrb[24].mxu1 %vm622_vm1, %v1342_v37 }
 0x1c4   :  { %v594_v57 = vadd.f32 1e-05, %v578_v45  ;;  %v564_v58 = vsub.f32 %v493_v56, %v548_v48  ;;  %v1345_v61 = vpop.f32.mrb[8].mxu1 }
 0x1c5   :  { %v581_v0 = vmax.f32 %v565_v53, 0.0  ;;  %v551_v1 = vmul.f32 %v1345_v61, %v1345_v61  ;;  %v342_v2 = vpop.f32.mrb[9].mxu1 }
 0x1c6   :  { %1564 = vrsqrt.f32 %v594_v57  ;;  %v580_v3 = vmax.f32 %v564_v58, 0.0  ;;  %v550_v4 = vmul.f32 %v342_v2, %v342_v2  ;;  %v1401_v5 = vpop.f32.mrb[24].mxu0  ;;  %1425 = vmatprep.mubr.msk.f32.mxu1 %vm622_vm1, %v342_v2 }
 0x1c7   :  { %1566 = vrsqrt.f32 %v595_v50  ;;  %v597_v6 = vadd.f32 1e-05, %v581_v0  ;;  %v567_v7 = vsub.f32 %v1401_v5, %v551_v1  ;;  %v503_v8 = vpop.f32.mrb[25].mxu0  ;;  %1426 = vmatmul.mubr.msk.f32.gmra.mrb[26].mxu1 %vm622_vm1, %v1345_v61 }
 0x1c8   :  { %v1557_v9 = vpop.eup %1556  ;;  %v596_v10 = vadd.f32 1e-05, %v580_v3  ;;  %v566_v11 = vsub.f32 %v503_v8, %v550_v4  ;;  %v1348_v12 = vpop.f32.mrb[10].mxu1 }
 0x1c9   :  { %v1559_v13 = vpop.eup %1558  ;;  %v583_v14 = vmax.f32 %v567_v7, 0.0  ;;  %v553_v15 = vmul.f32 %v1348_v12, %v1348_v12  ;;  %v352_v16 = vpop.f32.mrb[11].mxu1  ;;  %1439 = vmatprep.mubr.msk.f32.mxu0 %vm622_vm1, %v1557_v9 }
 0x1ca   :  { %1568 = vrsqrt.f32 %v596_v10  ;;  %v582_v17 = vmax.f32 %v566_v11, 0.0  ;;  %v552_v18 = vmul.f32 %v352_v16, %v352_v16  ;;  %v1404_v19 = vpop.f32.mrb[26].mxu0  ;;  %1428 = vmatprep.mubr.msk.f32.mxu1 %vm622_vm1, %v352_v16  ;;  %1440 = vmatmul.mubr.msk.f32.vlgmr.msra.gmra.mrb[30].mxu0 %vm622_vm1, %v1559_v13 }
 0x1cb   :  { %1570 = vrsqrt.f32 %v597_v6  ;;  %v599_v20 = vadd.f32 1e-05, %v583_v14  ;;  %v569_v21 = vsub.f32 %v1404_v19, %v553_v15  ;;  %v513_v22 = vpop.f32.mrb[27].mxu0  ;;  %1429 = vmatmul.mubr.msk.f32.gmra.mrb[28].mxu1 %vm622_vm1, %v1348_v12 }
 0x1cc   :  { %v1561_v23 = vpop.eup %1560  ;;  %v598_v24 = vadd.f32 1e-05, %v582_v17  ;;  %v568_v25 = vsub.f32 %v513_v22, %v552_v18  ;;  %v1351_v26 = vpop.f32.mrb[12].mxu1 }
 0x1cd   :  { %v1563_v27 = vpop.eup %1562  ;;  %v585_v28 = vmax.f32 %v569_v21, 0.0  ;;  %v555_v29 = vmul.f32 %v1351_v26, %v1351_v26  ;;  %v362_v30 = vpop.f32.mrb[13].mxu1  ;;  %1442 = vmatprep.mubr.msk.f32.mxu0 %vm622_vm1, %v1561_v23 }
 0x1ce   :  { %1572 = vrsqrt.f32 %v598_v24  ;;  %v584_v31 = vmax.f32 %v568_v25, 0.0  ;;  %v554_v32 = vmul.f32 %v362_v30, %v362_v30  ;;  %v1407_v33 = vpop.f32.mrb[28].mxu0  ;;  %1431 = vmatprep.mubr.msk.f32.mxu1 %vm622_vm1, %v362_v30  ;;  %1443 = vmatmul.mubr.msk.f32.gmra.mrb[32].mxu0 %vm622_vm1, %v1563_v27 }
 0x1cf   :  { %1574 = vrsqrt.f32 %v599_v20  ;;  %v601_v34 = vadd.f32 1e-05, %v585_v28  ;;  %v571_v37 = vsub.f32 %v1407_v33, %v555_v29  ;;  %v523_v40 = vpop.f32.mrb[29].mxu0  ;;  %1432 = vmatmul.mubr.msk.f32.gmra.mrb[30].mxu1 %vm622_vm1, %v1351_v26 }
 0x1d0   :  { %v1565_v41 = vpop.eup %1564  ;;  %v600_v42 = vadd.f32 1e-05, %v584_v31  ;;  %v570_v45 = vsub.f32 %v523_v40, %v554_v32  ;;  %v1354_v48 = vpop.f32.mrb[14].mxu1 }
 0x1d1   :  { %v1567_v49 = vpop.eup %1566  ;;  %v587_v50 = vmax.f32 %v571_v37, 0.0  ;;  %v372_v53 = vpop.f32.mrb[15].mxu1  ;;  %1445 = vmatprep.mubr.msk.f32.mxu0 %vm622_vm1, %v1565_v41  ;;  %v557_v58 = vmul.f32 %v1354_v48, %v1354_v48 }
 0x1d2   :  { %1576 = vrsqrt.f32 %v600_v42  ;;  %v586_v56 = vmax.f32 %v570_v45, 0.0  ;;  %1434 = vmatprep.mubr.msk.f32.mxu1 %vm622_vm1, %v372_v53  ;;  %1446 = vmatmul.mubr.msk.f32.gmra.mrb[34].mxu0 %vm622_vm1, %v1567_v49  ;;  %v556_v1 = vmul.f32 %v372_v53, %v372_v53 }
 0x1d3   :  { %1578 = vrsqrt.f32 %v601_v34  ;;  %v603_v57 = vadd.f32 1e-05, %v587_v50  ;;  %1435 = vmatmul.mubr.msk.f32.gmra.mrb[32].mxu1 %vm622_vm1, %v1354_v48 }
 0x1d4   :  { %v1569_v61 = vpop.eup %1568  ;;  %v602_v0 = vadd.f32 1e-05, %v586_v56  ;;  %v1410_v2 = vpop.f32.mrb[16].mxu1 }
 0x1d5   :  { %v1571_v3 = vpop.eup %1570  ;;  %v573_v4 = vsub.f32 %v1410_v2, %v557_v58  ;;  %v533_v5 = vpop.f32.mrb[17].mxu1  ;;  %1448 = vmatprep.mubr.msk.f32.mxu0 %vm622_vm1, %v1569_v61 }
 0x1d6   :  { %1580 = vrsqrt.f32 %v602_v0  ;;  %v572_v6 = vsub.f32 %v533_v5, %v556_v1  ;;  %1449 = vmatmul.mubr.msk.f32.gmra.mrb[36].mxu0 %vm622_vm1, %v1571_v3 }
 0x1d7   :  { %1582 = vrsqrt.f32 %v603_v57  ;;  %v589_v7 = vmax.f32 %v573_v4, 0.0 }
 0x1d8   :  { %v1573_v8 = vpop.eup %1572  ;;  %v588_v9 = vmax.f32 %v572_v6, 0.0 }
 0x1d9   :  { %v1575_v10 = vpop.eup %1574  ;;  %v605_v11 = vadd.f32 1e-05, %v589_v7  ;;  %1451 = vmatprep.mubr.msk.f32.mxu0 %vm622_vm1, %v1573_v8 }
 0x1da   :  { %v604_v12 = vadd.f32 1e-05, %v588_v9  ;;  %1452 = vmatmul.mubr.msk.f32.gmra.mrb[38].mxu0 %vm622_vm1, %v1575_v10 }
 0x1dc   :  { %v1577_v13 = vpop.eup %1576  ;;  %1584 = vrsqrt.f32 %v604_v12 }
 0x1dd   :  { %v1579_v14 = vpop.eup %1578  ;;  %1586 = vrsqrt.f32 %v605_v11  ;;  %1454 = vmatprep.mubr.msk.f32.mxu0 %vm622_vm1, %v1577_v13 }
 0x1de   :  { %1455 = vmatmul.mubr.msk.f32.gmra.mrb[40].mxu0 %vm622_vm1, %v1579_v14 }
 0x1e0   :  { %v1581_v15 = vpop.eup %1580 }
 0x1e1   :  { %v1583_v16 = vpop.eup %1582  ;;  %1457 = vmatprep.mubr.msk.f32.mxu0 %vm622_vm1, %v1581_v15 }
 0x1e2   :  { %1458 = vmatmul.mubr.msk.f32.gmra.mrb[42].mxu0 %vm622_vm1, %v1583_v16 }
 0x1e6   :  { %v1585_v17 = vpop.eup %1584 }
 0x1e7   :  { %v1587_v18 = vpop.eup %1586  ;;  %1460 = vmatprep.mubr.msk.f32.mxu0 %vm622_vm1, %v1585_v17 }
 0x1e8   :  { %1461 = vmatmul.mubr.msk.f32.gmra.mrb[44].mxu0 %vm622_vm1, %v1587_v18 }
 0x28a   :  { %v1415_v19 = vpop.f32.mrb[18].mxu1 }
 0x28b   :  { %v1010_v20 = vsub.f32 %v1800_v39, %v1415_v19  ;;  %v737_v21 = vpop.f32.mrb[19].mxu1 }
 0x28c   :  { %v1009_v22 = vsub.f32 %v1793_v36, %v737_v21 }
 0x28e   :  { %v1418_v23 = vpop.f32.mrb[20].mxu1 }
 0x28f   :  { %v1012_v24 = vsub.f32 %v1797_v38, %v1418_v23  ;;  %v747_v25 = vpop.f32.mrb[21].mxu1 }
 0x290   :  { %v1011_v26 = vsub.f32 %v1791_v35, %v747_v25  ;;  %v1934_v35 = vld [vmem:[%s1993_s2] ss:$0 sm:$0xff]  ;;  %s1612_s2 = smov [#allocation2]  }
 0x292   :  { %v1421_v27 = vpop.f32.mrb[22].mxu1 }
 0x293   :  { %v1014_v28 = vsub.f32 %v1824_v47, %v1421_v27  ;;  %v757_v29 = vpop.f32.mrb[23].mxu1 }
 0x294   :  { %v1013_v30 = vsub.f32 %v1817_v44, %v757_v29 }
 0x296   :  { %v1424_v31 = vpop.f32.mrb[24].mxu1 }
 0x297   :  { %v1016_v32 = vsub.f32 %v1821_v46, %v1424_v31  ;;  %v767_v33 = vpop.f32.mrb[25].mxu1  ;;  %v1939_v46 = vld [vmem:[%s1994_s3] ss:$0 sm:$0xff]  ;;  %s1108_s3 = sshll.u32 %s1612_s2, 4  ;;  %s1109_s3 = int_to_ptr.vmem [resolvable:$true] %s1108_s3 }
 0x298   :  { %v1015_v39 = vsub.f32 %v1813_v43, %v767_v33  ;;  %s1588_s26 = scalar_lea.vmem %s1109_s3, 2048  ;;  %p1593_p1 = scmp.lt.s32.totalorder %s1109_s3, %s1109_s3 }
 0x299   :  { %p1589_p0 = scmp.ne.s32.totalorder %s1109_s3, %s1588_s26  ;;  %p1594_p2 = scmp.lt.s32.totalorder %s1588_s26, %s1588_s26 }
 0x29a   :  { %v1427_v34 = vpop.f32.mrb[26].mxu1 }
 0x29b   :  { %v1018_v36 = vsub.f32 %v1848_v55, %v1427_v34  ;;  %v777_v37 = vpop.f32.mrb[27].mxu1  ;;  %p1595_p3 = por %p1594_p2, %p1593_p1 }
 0x29c   :  { %v1017_v38 = vsub.f32 %v1841_v52, %v777_v37 }
 0x29d   :  { %v1441_v40 = vpop.f32.mrb[30].mxu0  ;;  %p1596_p4 = pnand %p1595_p3, %p1589_p0 }
 0x29e   :  { %v1026_v47 = vmul.f32 %v1441_v40, %v1010_v20  ;;  %v1430_v44 = vpop.f32.mrb[28].mxu1  ;;  %v930_v41 = vpop.f32.mrb[31].mxu0 }
 0x29f   :  { %v1020_v43 = vsub.f32 %v1845_v54, %v1430_v44  ;;  %v1025_v55 = vmul.f32 %v1009_v22, %v930_v41  ;;  %v787_v42 = vpop.f32.mrb[29].mxu1 }
 0x2a0   :  { %v1049_v52 = vmul.f32 %v1934_v35, %v1026_v47  ;;  %v1019_v45 = vsub.f32 %v1837_v51, %v787_v42 }
 0x2a1   :  { %v1048_v48 = vmul.f32 %v1934_v35, %v1025_v55  ;;  %v1444_v49 = vpop.f32.mrb[32].mxu0 }
 0x2a2   :  { %v1072_v50 = vadd.f32 %v1939_v46, %v1049_v52  ;;  %v1028_v53 = vmul.f32 %v1444_v49, %v1012_v24  ;;  %v1433_v56 = vpop.f32.mrb[30].mxu1  ;;  %v940_v57 = vpop.f32.mrb[33].mxu0 }
 0x2a3   :  { %v1071_v58 = vadd.f32 %v1939_v46, %v1048_v48  ;;  %v1022_v61 = vsub.f32 %v1872_v63, %v1433_v56  ;;  %v1027_v0 = vmul.f32 %v1011_v26, %v940_v57  ;;  %v797_v54 = vpop.f32.mrb[31].mxu1 }
 0x2a4   :  { %1088 = vst [vmem:[#allocation2 + $0x8] sm:$0xff] %v1072_v50  ;;  %v1051_v1 = vmul.f32 %v1934_v35, %v1028_v53  ;;  %v1021_v2 = vsub.f32 %v1865_v60, %v797_v54 }
 0x2a5   :  { %1087 = vst [vmem:[#allocation2] sm:$0xff] %v1071_v58  ;;  %v1050_v51 = vmul.f32 %v1934_v35, %v1027_v0  ;;  %v1447_v3 = vpop.f32.mrb[34].mxu0 }
 0x2a6   :  { %v1074_v4 = vadd.f32 %v1939_v46, %v1051_v1  ;;  %v1030_v5 = vmul.f32 %v1447_v3, %v1014_v28  ;;  %v1436_v6 = vpop.f32.mrb[32].mxu1  ;;  %v950_v7 = vpop.f32.mrb[35].mxu0 }
 0x2a7   :  { %v1073_v8 = vadd.f32 %v1939_v46, %v1050_v51  ;;  %v1024_v63 = vsub.f32 %v1869_v62, %v1436_v6  ;;  %v1029_v9 = vmul.f32 %v1013_v30, %v950_v7  ;;  %v807_v10 = vpop.f32.mrb[33].mxu1 }
 0x2a8   :  { %1090 = vst [vmem:[#allocation2 + $0x18] sm:$0xff] %v1074_v4  ;;  %v1053_v11 = vmul.f32 %v1934_v35, %v1030_v5  ;;  %v1023_v60 = vsub.f32 %v1861_v59, %v807_v10 }
 0x2a9   :  { %1089 = vst [vmem:[#allocation2 + $0x10] sm:$0xff] %v1073_v8  ;;  %v1052_v12 = vmul.f32 %v1934_v35, %v1029_v9  ;;  %v1450_v13 = vpop.f32.mrb[36].mxu0 }
 0x2aa   :  { %v1076_v14 = vadd.f32 %v1939_v46, %v1053_v11  ;;  %v1032_v15 = vmul.f32 %v1450_v13, %v1016_v32  ;;  %v960_v16 = vpop.f32.mrb[37].mxu0 }
 0x2ab   :  { %v1075_v17 = vadd.f32 %v1939_v46, %v1052_v12  ;;  %v1031_v18 = vmul.f32 %v1015_v39, %v960_v16 }
 0x2ac   :  { %1092 = vst [vmem:[#allocation2 + $0x28] sm:$0xff] %v1076_v14  ;;  %v1055_v62 = vmul.f32 %v1934_v35, %v1032_v15 }
 0x2ad   :  { %1091 = vst [vmem:[#allocation2 + $0x20] sm:$0xff] %v1075_v17  ;;  %v1054_v19 = vmul.f32 %v1934_v35, %v1031_v18  ;;  %v1453_v20 = vpop.f32.mrb[38].mxu0 }
 0x2ae   :  { %v1078_v59 = vadd.f32 %v1939_v46, %v1055_v62  ;;  %v1034_v21 = vmul.f32 %v1453_v20, %v1018_v36  ;;  %v970_v22 = vpop.f32.mrb[39].mxu0 }
 0x2af   :  { %v1077_v23 = vadd.f32 %v1939_v46, %v1054_v19  ;;  %v1033_v24 = vmul.f32 %v1017_v38, %v970_v22 }
 0x2b0   :  { %1094 = vst [vmem:[#allocation2 + $0x38] sm:$0xff] %v1078_v59  ;;  %v1057_v25 = vmul.f32 %v1934_v35, %v1034_v21 }
 0x2b1   :  { %1093 = vst [vmem:[#allocation2 + $0x30] sm:$0xff] %v1077_v23  ;;  %v1056_v26 = vmul.f32 %v1934_v35, %v1033_v24  ;;  %v1456_v27 = vpop.f32.mrb[40].mxu0 }
 0x2b2   :  { %v1080_v28 = vadd.f32 %v1939_v46, %v1057_v25  ;;  %v1036_v29 = vmul.f32 %v1456_v27, %v1020_v43  ;;  %v980_v30 = vpop.f32.mrb[41].mxu0 }
 0x2b3   :  { %v1079_v31 = vadd.f32 %v1939_v46, %v1056_v26  ;;  %v1035_v32 = vmul.f32 %v1019_v45, %v980_v30 }
 0x2b4   :  { %1096 = vst [vmem:[#allocation2 + $0x48] sm:$0xff] %v1080_v28  ;;  %v1059_v33 = vmul.f32 %v1934_v35, %v1036_v29 }
 0x2b5   :  { %1095 = vst [vmem:[#allocation2 + $0x40] sm:$0xff] %v1079_v31  ;;  %v1058_v39 = vmul.f32 %v1934_v35, %v1035_v32  ;;  %v1459_v34 = vpop.f32.mrb[42].mxu0 }
 0x2b6   :  { %v1082_v36 = vadd.f32 %v1939_v46, %v1059_v33  ;;  %v1038_v37 = vmul.f32 %v1459_v34, %v1022_v61  ;;  %v990_v38 = vpop.f32.mrb[43].mxu0 }
 0x2b7   :  { %v1081_v40 = vadd.f32 %v1939_v46, %v1058_v39  ;;  %v1037_v47 = vmul.f32 %v1021_v2, %v990_v38 }
 0x2b8   :  { %1098 = vst [vmem:[#allocation2 + $0x58] sm:$0xff] %v1082_v36  ;;  %v1061_v44 = vmul.f32 %v1934_v35, %v1038_v37 }
 0x2b9   :  { %1097 = vst [vmem:[#allocation2 + $0x50] sm:$0xff] %v1081_v40  ;;  %v1060_v41 = vmul.f32 %v1934_v35, %v1037_v47 }
 0x2ba   :  { %v1084_v43 = vadd.f32 %v1939_v46, %v1061_v44 }
 0x2bb   :  { %v1083_v55 = vadd.f32 %v1939_v46, %v1060_v41  ;;  %v1462_v42 = vpop.f32.mrb[44].mxu0 }
 0x2bc   :  { %1100 = vst [vmem:[#allocation2 + $0x68] sm:$0xff] %v1084_v43  ;;  %v1040_v52 = vmul.f32 %v1462_v42, %v1024_v63  ;;  %v1000_v45 = vpop.f32.mrb[45].mxu0 }
 0x2bd   :  { %1099 = vst [vmem:[#allocation2 + $0x60] sm:$0xff] %v1083_v55  ;;  %v1039_v48 = vmul.f32 %v1023_v60, %v1000_v45 }
 0x2be   :  { %v1063_v49 = vmul.f32 %v1934_v35, %v1040_v52 }
 0x2bf   :  { %v1062_v50 = vmul.f32 %v1934_v35, %v1039_v48 }
 0x2c0   :  { %v1086_v53 = vadd.f32 %v1939_v46, %v1063_v49 }
 0x2c1   :  { %v1085_v56 = vadd.f32 %v1939_v46, %v1062_v50 }
 0x2c2   :  { %1102 = vst [vmem:[#allocation2 + $0x78] sm:$0xff] %v1086_v53 }
 0x2c3   :  { %1101 = vst [vmem:[#allocation2 + $0x70] sm:$0xff] %v1085_v56 }
 0x2c4   :  { %1599 = shalt.err (!%p1596_p4)
}
 0x2c5   :  { %s1600_s29 = scalar_lea.hbm %s1997_s6, 2048 }
 0x2c6   :  { %p1601_p5 = scmp.ne.s32.totalorder %s1997_s6, %s1600_s29  ;;  %p1604_p6 = scmp.lt.u32.totalorder %s1600_s29, %s1997_s6 }
 0x2c8   :  { %p1606_p7 = pnand %p1604_p6, %p1601_p5 }
 0x2ca   :  { %1609 = shalt.err (!%p1606_p7)
}
 0x2cb   :  { %s1613_s9 = smov 128   ;;  %s1614_s10 = smov 8  }
 0x2cc   :  { %1114 = dma.vmem_to_hbm [thread:$0]  %s1109_s3, 2048, %s1997_s6, [#allocation3], %s1613_s9, %s1613_s9, %s1614_s10  }
 0x2cd   :  { %1610 = dma.done.wait [#allocation3], 2048  }
 0x2ce   :  { %1611 = vsyncadd [#allocation3], 4294965248 }
 0x2cf   :  { %1118 = vsyncpa [#allocation3], 1 }

// kernel: tpu_custom_call.1
= control target key start
LH: loop header
LB: loop body
LE: loop exit
PB: predicated region body
PF: predicated region fallthrough
CT: control target
= control target key end

     0   :  { %vm97_vm0 = vcmask 261120   ;;  %s1991_s0 = inlined_call_operand.vmem [shape: bf16[128,32], index: 0, kind: input, shape index: {}]   ;;  %s1992_s1 = inlined_call_operand.vmem [shape: bf16[32,128], index: 1, kind: input, shape index: {}]   ;;  %s1993_s2 = inlined_call_operand.vmem [shape: f32[1,128], index: 2, kind: input, shape index: {}]   ;;  %s1994_s3 = inlined_call_operand.vmem [shape: f32[1,128], index: 3, kind: input, shape index: {}]   ;;  %s1995_s4 = inlined_call_operand.vmem [shape: f32[128,8], index: 4, kind: input, shape index: {}]   ;;  %s1996_s5 = inlined_call_operand.vmem [shape: f32[8,128], index: 5, kind: input, shape index: {}]   ;;  %s1997_s6 = inlined_call_operand.hbm [shape: f32[128,128], index: 6, kind: output, shape index: {}]  }
   0x1   :  { %v1546_v0 = vld [vmem:[%s1992_s1] sm:$0xff]   ;;  %v1547_v1 = vld [vmem:[%s1992_s1 + $0x8] sm:$0xff]   ;;  %v1550_v4 = vld [vmem:[%s1991_s0 + $0x10] sm:$0xff]  }
   0x2   :  { %1279 = vmatprep.subr.bf16.mxu0 %v1546_v0  ;;  %v1548_v2 = vld [vmem:[%s1991_s0] sm:$0xff]   ;;  %v1549_v3 = vld [vmem:[%s1991_s0 + $0x8] sm:$0xff]   ;;  %v221_v7 = vld [vmem:[%s1995_s4 + $0x10] sm:$0xff] }
   0x3   :  { %1280 = vmatpush3.bf16.msra.mxu0 %v1546_v0  ;;  %1283 = vmatprep.mubr.msk.bf16.mxu0 %vm97_vm0, %v1548_v2  ;;  %v219_v5 = vld [vmem:[%s1995_s4] sm:$0xff]  ;;  %v220_v6 = vld [vmem:[%s1995_s4 + $0x8] sm:$0xff]  ;;  %v222_v9 = vld [vmem:[%s1995_s4 + $0x18] sm:$0xff] }
   0x4   :  { %1281 = vmatprep.subr.bf16.mxu0 %v1547_v1  ;;  %v1677_v8 = vpack.c.bf16 %v220_v6, %v219_v5  ;;  %v1682_v10 = vpack.c.bf16 %v222_v9, %v221_v7  ;;  %v223_v11 = vld [vmem:[%s1995_s4 + $0x20] sm:$0xff]  ;;  %v224_v12 = vld [vmem:[%s1995_s4 + $0x28] sm:$0xff]  ;;  %v1551_v13 = vld [vmem:[%s1991_s0 + $0x18] sm:$0xff]  }
   0x5   :  { %v1552_v14 = vld [vmem:[%s1991_s0 + $0x20] sm:$0xff]   ;;  %v1702_v15 = vpack.c.bf16 %v224_v12, %v223_v11 }
   0x6   :  { %1464 = vmatprep.subr.bf16.mxu1 %v1677_v8 }
   0x7   :  { %1282 = vmatpush3.bf16.msra.mxu0 %v1547_v1  ;;  %1466 = vmatpush3.bf16.msra.mxu1 %v1677_v8 }
   0x8   :  { %1496 = vmatprep.subr.bf16.mxu0 %v1677_v8  ;;  %1468 = vmatprep.subr.bf16.mxu1 %v1682_v10 }
   0xa   :  { %1284 = vmatmul.mubr.msk.bf16.vlgmr.msra.gmra.mrb[0].mxu0 %vm97_vm0, %v1549_v3 }
   0xb   :  { %1287 = vmatprep.mubr.msk.bf16.mxu0 %vm97_vm0, %v1550_v4  ;;  %1498 = vmatpush3.bf16.msra.mxu0 %v1677_v8 }
   0xc   :  { %1500 = vmatprep.subr.bf16.mxu0 %v1682_v10 }
   0xd   :  { %11 = vsyncpa [#allocation3], 0  ;;  %v225_v16 = vld [vmem:[%s1995_s4 + $0x30] sm:$0xff]  ;;  %v226_v17 = vld [vmem:[%s1995_s4 + $0x38] sm:$0xff]  ;;  %1470 = vmatpush3.bf16.msra.mxu1 %v1682_v10  ;;  %vm622_vm1 = vcmask 64512  }
   0xe   :  { %1472 = vmatprep.subr.bf16.mxu1 %v1702_v15  ;;  %v1714_v18 = vpack.c.bf16 %v226_v17, %v225_v16  ;;  %v227_v19 = vld [vmem:[%s1995_s4 + $0x40] sm:$0xff]  ;;  %v228_v20 = vld [vmem:[%s1995_s4 + $0x48] sm:$0xff]  ;;  %v1554_v22 = vld [vmem:[%s1991_s0 + $0x30] sm:$0xff]  }
   0xf   :  { %1502 = vmatpush3.bf16.msra.mxu0 %v1682_v10  ;;  %v1553_v21 = vld [vmem:[%s1991_s0 + $0x28] sm:$0xff]   ;;  %v1732_v23 = vpack.c.bf16 %v228_v20, %v227_v19  ;;  %v229_v24 = vld [vmem:[%s1995_s4 + $0x50] sm:$0xff]  ;;  %v230_v25 = vld [vmem:[%s1995_s4 + $0x58] sm:$0xff] }
  0x10   :  { %1504 = vmatprep.subr.bf16.mxu0 %v1702_v15  ;;  %v1746_v26 = vpack.c.bf16 %v230_v25, %v229_v24  ;;  %v231_v27 = vld [vmem:[%s1995_s4 + $0x60] sm:$0xff]  ;;  %v232_v28 = vld [vmem:[%s1995_s4 + $0x68] sm:$0xff]  ;;  %v1555_v29 = vld [vmem:[%s1991_s0 + $0x38] sm:$0xff]  }
  0x11   :  { %1474 = vmatpush3.bf16.msra.mxu1 %v1702_v15  ;;  %v1761_v30 = vpack.c.bf16 %v232_v28, %v231_v27  ;;  %v233_v31 = vld [vmem:[%s1995_s4 + $0x70] sm:$0xff]  ;;  %v234_v32 = vld [vmem:[%s1995_s4 + $0x78] sm:$0xff]  ;;  %v1788_v34 = vld [vmem:[%s1996_s5] sm:$0xff] }
  0x12   :  { %1288 = vmatmul.mubr.msk.bf16.gmra.mrb[4].mxu0 %vm97_vm0, %v1551_v13  ;;  %1476 = vmatprep.subr.bf16.mxu1 %v1714_v18  ;;  %v1774_v33 = vpack.c.bf16 %v234_v32, %v233_v31 }
  0x13   :  { %1291 = vmatprep.mubr.msk.bf16.mxu0 %vm97_vm0, %v1552_v14  ;;  %1506 = vmatpush3.bf16.msra.mxu0 %v1702_v15 }
  0x14   :  { %1508 = vmatprep.subr.bf16.mxu0 %v1714_v18 }
  0x15   :  { %1478 = vmatpush3.bf16.msra.mxu1 %v1714_v18 }
  0x16   :  { %1480 = vmatprep.subr.bf16.mxu1 %v1732_v23 }
  0x17   :  { %1510 = vmatpush3.bf16.msra.mxu0 %v1714_v18 }
  0x18   :  { %1512 = vmatprep.subr.bf16.mxu0 %v1732_v23 }
  0x19   :  { %1482 = vmatpush3.bf16.msra.mxu1 %v1732_v23 }
  0x1a   :  { %1292 = vmatmul.mubr.msk.bf16.gmra.mrb[8].mxu0 %vm97_vm0, %v1553_v21  ;;  %1484 = vmatprep.subr.bf16.mxu1 %v1746_v26 }
  0x1b   :  { %1295 = vmatprep.mubr.msk.bf16.mxu0 %vm97_vm0, %v1554_v22  ;;  %1514 = vmatpush3.bf16.msra.mxu0 %v1732_v23 }
  0x1c   :  { %1516 = vmatprep.subr.bf16.mxu0 %v1746_v26 }
  0x1d   :  { %1486 = vmatpush3.bf16.msra.mxu1 %v1746_v26 }
  0x1e   :  { %1488 = vmatprep.subr.bf16.mxu1 %v1761_v30 }
  0x1f   :  { %1518 = vmatpush3.bf16.msra.mxu0 %v1746_v26 }
  0x20   :  { %1520 = vmatprep.subr.bf16.mxu0 %v1761_v30 }
  0x21   :  { %1490 = vmatpush3.bf16.msra.mxu1 %v1761_v30 }
  0x22   :  { %1296 = vmatmul.mubr.msk.bf16.gmra.mrb[12].mxu0 %vm97_vm0, %v1555_v29  ;;  %1492 = vmatprep.subr.bf16.mxu1 %v1774_v33 }
  0x23   :  { %1522 = vmatpush3.bf16.msra.mxu0 %v1761_v30 }
  0x24   :  { %1524 = vmatprep.subr.bf16.mxu0 %v1774_v33 }
  0x25   :  { %1494 = vmatpush3.bf16.msra.mxu1 %v1774_v33 }
  0x26   :  { %1527 = vmatprep.subr.bf16.mxu1 %v1677_v8 }
  0x27   :  { %1526 = vmatpush3.bf16.msra.mxu0 %v1774_v33 }
  0x28   :  { %1437 = vmatprep.subr.mxu0 %v1788_v34 }
  0xdd   :  { %v1791_v35 = vpop.f32.mrb[0].mxu0 }
  0xde   :  { %v1793_v36 = vpop.f32.mrb[1].mxu0  ;;  %v383_v41 = vmul.f32 %v1791_v35, %v1791_v35 }
  0xdf   :  { %v381_v37 = vmul.f32 %v1793_v36, %v1793_v36  ;;  %v1797_v38 = vpop.f32.mrb[2].mxu0  ;;  %1331 = vmatprep.mubr.f32.mxu1 %v1793_v36 }
  0xe0   :  { %v1800_v39 = vpop.f32.mrb[3].mxu0  ;;  %v384_v42 = vmul.f32 %v1797_v38, %v1797_v38 }
  0xe1   :  { %v382_v40 = vmul.f32 %v1800_v39, %v1800_v39  ;;  %1332 = vmatmul.mubr.f32.vlgmr.msra.gmra.mrb[0].mxu1 %v1800_v39  ;;  %1387 = vmatprep.mubr.f32.mxu0 %v381_v37 }
  0xe2   :  { %1535 = vmatpush3.bf16.msra.mxu1 %v1677_v8  ;;  %1334 = vmatprep.mubr.f32.mxu1 %v1791_v35 }
  0xe3   :  { %1388 = vmatmul.mubr.f32.vlgmr.msra.gmra.mrb[16].mxu0 %v382_v40  ;;  %1528 = vmatprep.subr.bf16.mxu1 %v1682_v10 }
  0xe4   :  { %1390 = vmatprep.mubr.f32.mxu0 %v383_v41  ;;  %1438 = vmatpush3.msra.mxu0 %v1788_v34 }
  0xe5   :  { %v1813_v43 = vpop.f32.mrb[4].mxu0  ;;  %1335 = vmatmul.mubr.f32.gmra.mrb[2].mxu1 %v1797_v38 }
  0xe6   :  { %1536 = vmatpush3.bf16.msra.mxu1 %v1682_v10  ;;  %v1817_v44 = vpop.f32.mrb[5].mxu0  ;;  %v387_v49 = vmul.f32 %v1813_v43, %v1813_v43 }
  0xe7   :  { %v385_v45 = vmul.f32 %v1817_v44, %v1817_v44  ;;  %v1821_v46 = vpop.f32.mrb[6].mxu0  ;;  %1337 = vmatprep.mubr.f32.mxu1 %v1817_v44  ;;  %1391 = vmatmul.mubr.f32.gmra.mrb[18].mxu0 %v384_v42 }
  0xe8   :  { %v1824_v47 = vpop.f32.mrb[7].mxu0  ;;  %1529 = vmatprep.subr.bf16.mxu1 %v1702_v15  ;;  %v388_v50 = vmul.f32 %v1821_v46, %v1821_v46 }
  0xe9   :  { %v386_v48 = vmul.f32 %v1824_v47, %v1824_v47  ;;  %1338 = vmatmul.mubr.f32.gmra.mrb[4].mxu1 %v1824_v47  ;;  %1393 = vmatprep.mubr.f32.mxu0 %v385_v45 }
  0xea   :  { %1537 = vmatpush3.bf16.msra.mxu1 %v1702_v15  ;;  %1340 = vmatprep.mubr.f32.mxu1 %v1813_v43 }
  0xeb   :  { %1394 = vmatmul.mubr.f32.gmra.mrb[20].mxu0 %v386_v48  ;;  %1530 = vmatprep.subr.bf16.mxu1 %v1714_v18 }
  0xec   :  { %1396 = vmatprep.mubr.f32.mxu0 %v387_v49 }
  0xed   :  { %v1837_v51 = vpop.f32.mrb[8].mxu0  ;;  %1341 = vmatmul.mubr.f32.gmra.mrb[6].mxu1 %v1821_v46 }
  0xee   :  { %1538 = vmatpush3.bf16.msra.mxu1 %v1714_v18  ;;  %v1841_v52 = vpop.f32.mrb[9].mxu0  ;;  %v391_v57 = vmul.f32 %v1837_v51, %v1837_v51 }
  0xef   :  { %v389_v53 = vmul.f32 %v1841_v52, %v1841_v52  ;;  %v1845_v54 = vpop.f32.mrb[10].mxu0  ;;  %1343 = vmatprep.mubr.f32.mxu1 %v1841_v52  ;;  %1397 = vmatmul.mubr.f32.gmra.mrb[22].mxu0 %v388_v50 }
  0xf0   :  { %v1848_v55 = vpop.f32.mrb[11].mxu0  ;;  %1531 = vmatprep.subr.bf16.mxu1 %v1732_v23  ;;  %v392_v58 = vmul.f32 %v1845_v54, %v1845_v54 }
  0xf1   :  { %v390_v56 = vmul.f32 %v1848_v55, %v1848_v55  ;;  %1344 = vmatmul.mubr.f32.gmra.mrb[8].mxu1 %v1848_v55  ;;  %1399 = vmatprep.mubr.f32.mxu0 %v389_v53 }
  0xf2   :  { %1539 = vmatpush3.bf16.msra.mxu1 %v1732_v23  ;;  %1346 = vmatprep.mubr.f32.mxu1 %v1837_v51 }
  0xf3   :  { %1400 = vmatmul.mubr.f32.gmra.mrb[24].mxu0 %v390_v56  ;;  %1532 = vmatprep.subr.bf16.mxu1 %v1746_v26 }
  0xf4   :  { %1402 = vmatprep.mubr.f32.mxu0 %v391_v57 }
  0xf5   :  { %v1861_v59 = vpop.f32.mrb[12].mxu0  ;;  %1347 = vmatmul.mubr.f32.gmra.mrb[10].mxu1 %v1845_v54 }
  0xf6   :  { %1540 = vmatpush3.bf16.msra.mxu1 %v1746_v26  ;;  %v1865_v60 = vpop.f32.mrb[13].mxu0  ;;  %v395_v1 = vmul.f32 %v1861_v59, %v1861_v59 }
  0xf7   :  { %v393_v61 = vmul.f32 %v1865_v60, %v1865_v60  ;;  %v1869_v62 = vpop.f32.mrb[14].mxu0  ;;  %1349 = vmatprep.mubr.f32.mxu1 %v1865_v60  ;;  %1403 = vmatmul.mubr.f32.gmra.mrb[26].mxu0 %v392_v58 }
  0xf8   :  { %v1872_v63 = vpop.f32.mrb[15].mxu0  ;;  %1533 = vmatprep.subr.bf16.mxu1 %v1761_v30  ;;  %v396_v2 = vmul.f32 %v1869_v62, %v1869_v62 }
  0xf9   :  { %v394_v0 = vmul.f32 %v1872_v63, %v1872_v63  ;;  %1350 = vmatmul.mubr.f32.gmra.mrb[12].mxu1 %v1872_v63  ;;  %1405 = vmatprep.mubr.f32.mxu0 %v393_v61 }
  0xfa   :  { %1541 = vmatpush3.bf16.msra.mxu1 %v1761_v30  ;;  %1352 = vmatprep.mubr.f32.mxu1 %v1861_v59 }
  0xfb   :  { %1406 = vmatmul.mubr.f32.gmra.mrb[28].mxu0 %v394_v0  ;;  %1534 = vmatprep.subr.bf16.mxu1 %v1774_v33 }
  0xfd   :  { %1353 = vmatmul.mubr.f32.gmra.mrb[14].mxu1 %v1869_v62 }
  0xfe   :  { %1542 = vmatpush3.bf16.msra.mxu1 %v1774_v33  ;;  %1408 = vmatprep.mubr.f32.mxu1 %v395_v1 }
  0xff   :  { %1411 = vmatprep.subr.mxu1 %v1788_v34 }
 0x101   :  { %1409 = vmatmul.mubr.f32.vlgmr.msra.gmra.mrb[16].mxu1 %v396_v2 }
 0x102   :  { %1412 = vmatpush3.msra.mxu1 %v1788_v34 }
 0x1b4   :  { %v1333_v3 = vpop.f32.mrb[0].mxu1 }
 0x1b5   :  { %v543_v4 = vmul.f32 %v1333_v3, %v1333_v3  ;;  %v302_v5 = vpop.f32.mrb[1].mxu1 }
 0x1b6   :  { %v542_v6 = vmul.f32 %v302_v5, %v302_v5  ;;  %v1389_v7 = vpop.f32.mrb[16].mxu0  ;;  %1413 = vmatprep.mubr.msk.f32.mxu1 %vm622_vm1, %v302_v5 }
 0x1b7   :  { %v559_v8 = vsub.f32 %v1389_v7, %v543_v4  ;;  %v463_v9 = vpop.f32.mrb[17].mxu0  ;;  %1414 = vmatmul.mubr.msk.f32.vlgmr.msra.gmra.mrb[18].mxu1 %vm622_vm1, %v1333_v3 }
 0x1b8   :  { %v558_v10 = vsub.f32 %v463_v9, %v542_v6  ;;  %v1336_v11 = vpop.f32.mrb[2].mxu1 }
 0x1b9   :  { %v575_v12 = vmax.f32 %v559_v8, 0.0  ;;  %v545_v13 = vmul.f32 %v1336_v11, %v1336_v11  ;;  %v312_v14 = vpop.f32.mrb[3].mxu1 }
 0x1ba   :  { %v574_v15 = vmax.f32 %v558_v10, 0.0  ;;  %v544_v16 = vmul.f32 %v312_v14, %v312_v14  ;;  %v1392_v17 = vpop.f32.mrb[18].mxu0  ;;  %1416 = vmatprep.mubr.msk.f32.mxu1 %vm622_vm1, %v312_v14 }
 0x1bb   :  { %v591_v18 = vadd.f32 1e-05, %v575_v12  ;;  %v561_v19 = vsub.f32 %v1392_v17, %v545_v13  ;;  %v473_v20 = vpop.f32.mrb[19].mxu0  ;;  %1417 = vmatmul.mubr.msk.f32.gmra.mrb[20].mxu1 %vm622_vm1, %v1336_v11 }
 0x1bc   :  { %v590_v21 = vadd.f32 1e-05, %v574_v15  ;;  %v560_v22 = vsub.f32 %v473_v20, %v544_v16  ;;  %v1339_v23 = vpop.f32.mrb[4].mxu1 }
 0x1bd   :  { %v577_v24 = vmax.f32 %v561_v19, 0.0  ;;  %v547_v25 = vmul.f32 %v1339_v23, %v1339_v23  ;;  %v322_v26 = vpop.f32.mrb[5].mxu1 }
 0x1be   :  { %1556 = vrsqrt.f32 %v590_v21  ;;  %v576_v27 = vmax.f32 %v560_v22, 0.0  ;;  %v546_v28 = vmul.f32 %v322_v26, %v322_v26  ;;  %v1395_v29 = vpop.f32.mrb[20].mxu0  ;;  %1419 = vmatprep.mubr.msk.f32.mxu1 %vm622_vm1, %v322_v26 }
 0x1bf   :  { %1558 = vrsqrt.f32 %v591_v18  ;;  %v593_v30 = vadd.f32 1e-05, %v577_v24  ;;  %v563_v31 = vsub.f32 %v1395_v29, %v547_v25  ;;  %v483_v32 = vpop.f32.mrb[21].mxu0  ;;  %1420 = vmatmul.mubr.msk.f32.gmra.mrb[22].mxu1 %vm622_vm1, %v1339_v23 }
 0x1c0   :  { %v592_v33 = vadd.f32 1e-05, %v576_v27  ;;  %v562_v34 = vsub.f32 %v483_v32, %v546_v28  ;;  %v1342_v37 = vpop.f32.mrb[6].mxu1 }
 0x1c1   :  { %v579_v40 = vmax.f32 %v563_v31, 0.0  ;;  %v549_v41 = vmul.f32 %v1342_v37, %v1342_v37  ;;  %v332_v42 = vpop.f32.mrb[7].mxu1 }
 0x1c2   :  { %1560 = vrsqrt.f32 %v592_v33  ;;  %v578_v45 = vmax.f32 %v562_v34, 0.0  ;;  %v548_v48 = vmul.f32 %v332_v42, %v332_v42  ;;  %v1398_v49 = vpop.f32.mrb[22].mxu0  ;;  %1422 = vmatprep.mubr.msk.f32.mxu1 %vm622_vm1, %v332_v42 }
 0x1c3   :  { %1562 = vrsqrt.f32 %v593_v30  ;;  %v595_v50 = vadd.f32 1e-05, %v579_v40  ;;  %v565_v53 = vsub.f32 %v1398_v49, %v549_v41  ;;  %v493_v56 = vpop.f32.mrb[23].mxu0  ;;  %1423 = vmatmul.mubr.msk.f32.gmra.mrb[24].mxu1 %vm622_vm1, %v1342_v37 }
 0x1c4   :  { %v594_v57 = vadd.f32 1e-05, %v578_v45  ;;  %v564_v58 = vsub.f32 %v493_v56, %v548_v48  ;;  %v1345_v61 = vpop.f32.mrb[8].mxu1 }
 0x1c5   :  { %v581_v0 = vmax.f32 %v565_v53, 0.0  ;;  %v551_v1 = vmul.f32 %v1345_v61, %v1345_v61  ;;  %v342_v2 = vpop.f32.mrb[9].mxu1 }
 0x1c6   :  { %1564 = vrsqrt.f32 %v594_v57  ;;  %v580_v3 = vmax.f32 %v564_v58, 0.0  ;;  %v550_v4 = vmul.f32 %v342_v2, %v342_v2  ;;  %v1401_v5 = vpop.f32.mrb[24].mxu0  ;;  %1425 = vmatprep.mubr.msk.f32.mxu1 %vm622_vm1, %v342_v2 }
 0x1c7   :  { %1566 = vrsqrt.f32 %v595_v50  ;;  %v597_v6 = vadd.f32 1e-05, %v581_v0  ;;  %v567_v7 = vsub.f32 %v1401_v5, %v551_v1  ;;  %v503_v8 = vpop.f32.mrb[25].mxu0  ;;  %1426 = vmatmul.mubr.msk.f32.gmra.mrb[26].mxu1 %vm622_vm1, %v1345_v61 }
 0x1c8   :  { %v1557_v9 = vpop.eup %1556  ;;  %v596_v10 = vadd.f32 1e-05, %v580_v3  ;;  %v566_v11 = vsub.f32 %v503_v8, %v550_v4  ;;  %v1348_v12 = vpop.f32.mrb[10].mxu1 }
 0x1c9   :  { %v1559_v13 = vpop.eup %1558  ;;  %v583_v14 = vmax.f32 %v567_v7, 0.0  ;;  %v553_v15 = vmul.f32 %v1348_v12, %v1348_v12  ;;  %v352_v16 = vpop.f32.mrb[11].mxu1  ;;  %1439 = vmatprep.mubr.msk.f32.mxu0 %vm622_vm1, %v1557_v9 }
 0x1ca   :  { %1568 = vrsqrt.f32 %v596_v10  ;;  %v582_v17 = vmax.f32 %v566_v11, 0.0  ;;  %v552_v18 = vmul.f32 %v352_v16, %v352_v16  ;;  %v1404_v19 = vpop.f32.mrb[26].mxu0  ;;  %1428 = vmatprep.mubr.msk.f32.mxu1 %vm622_vm1, %v352_v16  ;;  %1440 = vmatmul.mubr.msk.f32.vlgmr.msra.gmra.mrb[30].mxu0 %vm622_vm1, %v1559_v13 }
 0x1cb   :  { %1570 = vrsqrt.f32 %v597_v6  ;;  %v599_v20 = vadd.f32 1e-05, %v583_v14  ;;  %v569_v21 = vsub.f32 %v1404_v19, %v553_v15  ;;  %v513_v22 = vpop.f32.mrb[27].mxu0  ;;  %1429 = vmatmul.mubr.msk.f32.gmra.mrb[28].mxu1 %vm622_vm1, %v1348_v12 }
 0x1cc   :  { %v1561_v23 = vpop.eup %1560  ;;  %v598_v24 = vadd.f32 1e-05, %v582_v17  ;;  %v568_v25 = vsub.f32 %v513_v22, %v552_v18  ;;  %v1351_v26 = vpop.f32.mrb[12].mxu1 }
 0x1cd   :  { %v1563_v27 = vpop.eup %1562  ;;  %v585_v28 = vmax.f32 %v569_v21, 0.0  ;;  %v555_v29 = vmul.f32 %v1351_v26, %v1351_v26  ;;  %v362_v30 = vpop.f32.mrb[13].mxu1  ;;  %1442 = vmatprep.mubr.msk.f32.mxu0 %vm622_vm1, %v1561_v23 }
 0x1ce   :  { %1572 = vrsqrt.f32 %v598_v24  ;;  %v584_v31 = vmax.f32 %v568_v25, 0.0  ;;  %v554_v32 = vmul.f32 %v362_v30, %v362_v30  ;;  %v1407_v33 = vpop.f32.mrb[28].mxu0  ;;  %1431 = vmatprep.mubr.msk.f32.mxu1 %vm622_vm1, %v362_v30  ;;  %1443 = vmatmul.mubr.msk.f32.gmra.mrb[32].mxu0 %vm622_vm1, %v1563_v27 }
 0x1cf   :  { %1574 = vrsqrt.f32 %v599_v20  ;;  %v601_v34 = vadd.f32 1e-05, %v585_v28  ;;  %v571_v37 = vsub.f32 %v1407_v33, %v555_v29  ;;  %v523_v40 = vpop.f32.mrb[29].mxu0  ;;  %1432 = vmatmul.mubr.msk.f32.gmra.mrb[30].mxu1 %vm622_vm1, %v1351_v26 }
 0x1d0   :  { %v1565_v41 = vpop.eup %1564  ;;  %v600_v42 = vadd.f32 1e-05, %v584_v31  ;;  %v570_v45 = vsub.f32 %v523_v40, %v554_v32  ;;  %v1354_v48 = vpop.f32.mrb[14].mxu1 }
 0x1d1   :  { %v1567_v49 = vpop.eup %1566  ;;  %v587_v50 = vmax.f32 %v571_v37, 0.0  ;;  %v372_v53 = vpop.f32.mrb[15].mxu1  ;;  %1445 = vmatprep.mubr.msk.f32.mxu0 %vm622_vm1, %v1565_v41  ;;  %v557_v58 = vmul.f32 %v1354_v48, %v1354_v48 }
 0x1d2   :  { %1576 = vrsqrt.f32 %v600_v42  ;;  %v586_v56 = vmax.f32 %v570_v45, 0.0  ;;  %1434 = vmatprep.mubr.msk.f32.mxu1 %vm622_vm1, %v372_v53  ;;  %1446 = vmatmul.mubr.msk.f32.gmra.mrb[34].mxu0 %vm622_vm1, %v1567_v49  ;;  %v556_v1 = vmul.f32 %v372_v53, %v372_v53 }
 0x1d3   :  { %1578 = vrsqrt.f32 %v601_v34  ;;  %v603_v57 = vadd.f32 1e-05, %v587_v50  ;;  %1435 = vmatmul.mubr.msk.f32.gmra.mrb[32].mxu1 %vm622_vm1, %v1354_v48 }
 0x1d4   :  { %v1569_v61 = vpop.eup %1568  ;;  %v602_v0 = vadd.f32 1e-05, %v586_v56  ;;  %v1410_v2 = vpop.f32.mrb[16].mxu1 }
 0x1d5   :  { %v1571_v3 = vpop.eup %1570  ;;  %v573_v4 = vsub.f32 %v1410_v2, %v557_v58  ;;  %v533_v5 = vpop.f32.mrb[17].mxu1  ;;  %1448 = vmatprep.mubr.msk.f32.mxu0 %vm622_vm1, %v1569_v61 }
 0x1d6   :  { %1580 = vrsqrt.f32 %v602_v0  ;;  %v572_v6 = vsub.f32 %v533_v5, %v556_v1  ;;  %1449 = vmatmul.mubr.msk.f32.gmra.mrb[36].mxu0 %vm622_vm1, %v1571_v3 }
 0x1d7   :  { %1582 = vrsqrt.f32 %v603_v57  ;;  %v589_v7 = vmax.f32 %v573_v4, 0.0 }
 0x1d8   :  { %v1573_v8 = vpop.eup %1572  ;;  %v588_v9 = vmax.f32 %v572_v6, 0.0 }
 0x1d9   :  { %v1575_v10 = vpop.eup %1574  ;;  %v605_v11 = vadd.f32 1e-05, %v589_v7  ;;  %1451 = vmatprep.mubr.msk.f32.mxu0 %vm622_vm1, %v1573_v8 }
 0x1da   :  { %v604_v12 = vadd.f32 1e-05, %v588_v9  ;;  %1452 = vmatmul.mubr.msk.f32.gmra.mrb[38].mxu0 %vm622_vm1, %v1575_v10 }
 0x1dc   :  { %v1577_v13 = vpop.eup %1576  ;;  %1584 = vrsqrt.f32 %v604_v12 }
 0x1dd   :  { %v1579_v14 = vpop.eup %1578  ;;  %1586 = vrsqrt.f32 %v605_v11  ;;  %1454 = vmatprep.mubr.msk.f32.mxu0 %vm622_vm1, %v1577_v13 }
 0x1de   :  { %1455 = vmatmul.mubr.msk.f32.gmra.mrb[40].mxu0 %vm622_vm1, %v1579_v14 }
 0x1e0   :  { %v1581_v15 = vpop.eup %1580 }
 0x1e1   :  { %v1583_v16 = vpop.eup %1582  ;;  %1457 = vmatprep.mubr.msk.f32.mxu0 %vm622_vm1, %v1581_v15 }
 0x1e2   :  { %1458 = vmatmul.mubr.msk.f32.gmra.mrb[42].mxu0 %vm622_vm1, %v1583_v16 }
 0x1e6   :  { %v1585_v17 = vpop.eup %1584 }
 0x1e7   :  { %v1587_v18 = vpop.eup %1586  ;;  %1460 = vmatprep.mubr.msk.f32.mxu0 %vm622_vm1, %v1585_v17 }
 0x1e8   :  { %1461 = vmatmul.mubr.msk.f32.gmra.mrb[44].mxu0 %vm622_vm1, %v1587_v18 }
 0x28a   :  { %v1415_v19 = vpop.f32.mrb[18].mxu1 }
 0x28b   :  { %v1010_v20 = vsub.f32 %v1800_v39, %v1415_v19  ;;  %v737_v21 = vpop.f32.mrb[19].mxu1 }
 0x28c   :  { %v1009_v22 = vsub.f32 %v1793_v36, %v737_v21 }
 0x28e   :  { %v1418_v23 = vpop.f32.mrb[20].mxu1 }
 0x28f   :  { %v1012_v24 = vsub.f32 %v1797_v38, %v1418_v23  ;;  %v747_v25 = vpop.f32.mrb[21].mxu1 }
 0x290   :  { %v1011_v26 = vsub.f32 %v1791_v35, %v747_v25  ;;  %v1934_v35 = vld [vmem:[%s1993_s2] ss:$0 sm:$0xff]  ;;  %s1612_s2 = smov [#allocation2]  }
 0x292   :  { %v1421_v27 = vpop.f32.mrb[22].mxu1 }
 0x293   :  { %v1014_v28 = vsub.f32 %v1824_v47, %v1421_v27  ;;  %v757_v29 = vpop.f32.mrb[23].mxu1 }
 0x294   :  { %v1013_v30 = vsub.f32 %v1817_v44, %v757_v29 }
 0x296   :  { %v1424_v31 = vpop.f32.mrb[24].mxu1 }
 0x297   :  { %v1016_v32 = vsub.f32 %v1821_v46, %v1424_v31  ;;  %v767_v33 = vpop.f32.mrb[25].mxu1  ;;  %v1939_v46 = vld [vmem:[%s1994_s3] ss:$0 sm:$0xff]  ;;  %s1108_s3 = sshll.u32 %s1612_s2, 4  ;;  %s1109_s3 = int_to_ptr.vmem [resolvable:$true] %s1108_s3 }
 0x298   :  { %v1015_v39 = vsub.f32 %v1813_v43, %v767_v33  ;;  %s1588_s26 = scalar_lea.vmem %s1109_s3, 2048  ;;  %p1593_p1 = scmp.lt.s32.totalorder %s1109_s3, %s1109_s3 }
 0x299   :  { %p1589_p0 = scmp.ne.s32.totalorder %s1109_s3, %s1588_s26  ;;  %p1594_p2 = scmp.lt.s32.totalorder %s1588_s26, %s1588_s26 }
 0x29a   :  { %v1427_v34 = vpop.f32.mrb[26].mxu1 }
 0x29b   :  { %v1018_v36 = vsub.f32 %v1848_v55, %v1427_v34  ;;  %v777_v37 = vpop.f32.mrb[27].mxu1  ;;  %p1595_p3 = por %p1594_p2, %p1593_p1 }
 0x29c   :  { %v1017_v38 = vsub.f32 %v1841_v52, %v777_v37 }
 0x29d   :  { %v1441_v40 = vpop.f32.mrb[30].mxu0  ;;  %p1596_p4 = pnand %p1595_p3, %p1589_p0 }
 0x29e   :  { %v1026_v47 = vmul.f32 %v1441_v40, %v1010_v20  ;;  %v1430_v44 = vpop.f32.mrb[28].mxu1  ;;  %v930_v41 = vpop.f32.mrb[31].mxu0 }
 0x29f   :  { %v1020_v43 = vsub.f32 %v1845_v54, %v1430_v44  ;;  %v1025_v55 = vmul.f32 %v1009_v22, %v930_v41  ;;  %v787_v42 = vpop.f32.mrb[29].mxu1 }
 0x2a0   :  { %v1049_v52 = vmul.f32 %v1934_v35, %v1026_v47  ;;  %v1019_v45 = vsub.f32 %v1837_v51, %v787_v42 }
 0x2a1   :  { %v1048_v48 = vmul.f32 %v1934_v35, %v1025_v55  ;;  %v1444_v49 = vpop.f32.mrb[32].mxu0 }
 0x2a2   :  { %v1072_v50 = vadd.f32 %v1939_v46, %v1049_v52  ;;  %v1028_v53 = vmul.f32 %v1444_v49, %v1012_v24  ;;  %v1433_v56 = vpop.f32.mrb[30].mxu1  ;;  %v940_v57 = vpop.f32.mrb[33].mxu0 }
 0x2a3   :  { %v1071_v58 = vadd.f32 %v1939_v46, %v1048_v48  ;;  %v1022_v61 = vsub.f32 %v1872_v63, %v1433_v56  ;;  %v1027_v0 = vmul.f32 %v1011_v26, %v940_v57  ;;  %v797_v54 = vpop.f32.mrb[31].mxu1 }
 0x2a4   :  { %1088 = vst [vmem:[#allocation2 + $0x8] sm:$0xff] %v1072_v50  ;;  %v1051_v1 = vmul.f32 %v1934_v35, %v1028_v53  ;;  %v1021_v2 = vsub.f32 %v1865_v60, %v797_v54 }
 0x2a5   :  { %1087 = vst [vmem:[#allocation2] sm:$0xff] %v1071_v58  ;;  %v1050_v51 = vmul.f32 %v1934_v35, %v1027_v0  ;;  %v1447_v3 = vpop.f32.mrb[34].mxu0 }
 0x2a6   :  { %v1074_v4 = vadd.f32 %v1939_v46, %v1051_v1  ;;  %v1030_v5 = vmul.f32 %v1447_v3, %v1014_v28  ;;  %v1436_v6 = vpop.f32.mrb[32].mxu1  ;;  %v950_v7 = vpop.f32.mrb[35].mxu0 }
 0x2a7   :  { %v1073_v8 = vadd.f32 %v1939_v46, %v1050_v51  ;;  %v1024_v63 = vsub.f32 %v1869_v62, %v1436_v6  ;;  %v1029_v9 = vmul.f32 %v1013_v30, %v950_v7  ;;  %v807_v10 = vpop.f32.mrb[33].mxu1 }
 0x2a8   :  { %1090 = vst [vmem:[#allocation2 + $0x18] sm:$0xff] %v1074_v4  ;;  %v1053_v11 = vmul.f32 %v1934_v35, %v1030_v5  ;;  %v1023_v60 = vsub.f32 %v1861_v59, %v807_v10 }
 0x2a9   :  { %1089 = vst [vmem:[#allocation2 + $0x10] sm:$0xff] %v1073_v8  ;;  %v1052_v12 = vmul.f32 %v1934_v35, %v1029_v9  ;;  %v1450_v13 = vpop.f32.mrb[36].mxu0 }
 0x2aa   :  { %v1076_v14 = vadd.f32 %v1939_v46, %v1053_v11  ;;  %v1032_v15 = vmul.f32 %v1450_v13, %v1016_v32  ;;  %v960_v16 = vpop.f32.mrb[37].mxu0 }
 0x2ab   :  { %v1075_v17 = vadd.f32 %v1939_v46, %v1052_v12  ;;  %v1031_v18 = vmul.f32 %v1015_v39, %v960_v16 }
 0x2ac   :  { %1092 = vst [vmem:[#allocation2 + $0x28] sm:$0xff] %v1076_v14  ;;  %v1055_v62 = vmul.f32 %v1934_v35, %v1032_v15 }
 0x2ad   :  { %1091 = vst [vmem:[#allocation2 + $0x20] sm:$0xff] %v1075_v17  ;;  %v1054_v19 = vmul.f32 %v1934_v35, %v1031_v18  ;;  %v1453_v20 = vpop.f32.mrb[38].mxu0 }
 0x2ae   :  { %v1078_v59 = vadd.f32 %v1939_v46, %v1055_v62  ;;  %v1034_v21 = vmul.f32 %v1453_v20, %v1018_v36  ;;  %v970_v22 = vpop.f32.mrb[39].mxu0 }
 0x2af   :  { %v1077_v23 = vadd.f32 %v1939_v46, %v1054_v19  ;;  %v1033_v24 = vmul.f32 %v1017_v38, %v970_v22 }
 0x2b0   :  { %1094 = vst [vmem:[#allocation2 + $0x38] sm:$0xff] %v1078_v59  ;;  %v1057_v25 = vmul.f32 %v1934_v35, %v1034_v21 }
 0x2b1   :  { %1093 = vst [vmem:[#allocation2 + $0x30] sm:$0xff] %v1077_v23  ;;  %v1056_v26 = vmul.f32 %v1934_v35, %v1033_v24  ;;  %v1456_v27 = vpop.f32.mrb[40].mxu0 }
 0x2b2   :  { %v1080_v28 = vadd.f32 %v1939_v46, %v1057_v25  ;;  %v1036_v29 = vmul.f32 %v1456_v27, %v1020_v43  ;;  %v980_v30 = vpop.f32.mrb[41].mxu0 }
 0x2b3   :  { %v1079_v31 = vadd.f32 %v1939_v46, %v1056_v26  ;;  %v1035_v32 = vmul.f32 %v1019_v45, %v980_v30 }
 0x2b4   :  { %1096 = vst [vmem:[#allocation2 + $0x48] sm:$0xff] %v1080_v28  ;;  %v1059_v33 = vmul.f32 %v1934_v35, %v1036_v29 }
 0x2b5   :  { %1095 = vst [vmem:[#allocation2 + $0x40] sm:$0xff] %v1079_v31  ;;  %v1058_v39 = vmul.f32 %v1934_v35, %v1035_v32  ;;  %v1459_v34 = vpop.f32.mrb[42].mxu0 }
 0x2b6   :  { %v1082_v36 = vadd.f32 %v1939_v46, %v1059_v33  ;;  %v1038_v37 = vmul.f32 %v1459_v34, %v1022_v61  ;;  %v990_v38 = vpop.f32.mrb[43].mxu0 }
 0x2b7   :  { %v1081_v40 = vadd.f32 %v1939_v46, %v1058_v39  ;;  %v1037_v47 = vmul.f32 %v1021_v2, %v990_v38 }
 0x2b8   :  { %1098 = vst [vmem:[#allocation2 + $0x58] sm:$0xff] %v1082_v36  ;;  %v1061_v44 = vmul.f32 %v1934_v35, %v1038_v37 }
 0x2b9   :  { %1097 = vst [vmem:[#allocation2 + $0x50] sm:$0xff] %v1081_v40  ;;  %v1060_v41 = vmul.f32 %v1934_v35, %v1037_v47 }
 0x2ba   :  { %v1084_v43 = vadd.f32 %v1939_v46, %v1061_v44 }
 0x2bb   :  { %v1083_v55 = vadd.f32 %v1939_v46, %v1060_v41  ;;  %v1462_v42 = vpop.f32.mrb[44].mxu0 }
 0x2bc   :  { %1100 = vst [vmem:[#allocation2 + $0x68] sm:$0xff] %v1084_v43  ;;  %v1040_v52 = vmul.f32 %v1462_v42, %v1024_v63  ;;  %v1000_v45 = vpop.f32.mrb[45].mxu0 }
 0x2bd   :  { %1099 = vst [vmem:[#allocation2 + $0x60] sm:$0xff] %v1083_v55  ;;  %v1039_v48 = vmul.f32 %v1023_v60, %v1000_v45 }
 0x2be   :  { %v1063_v49 = vmul.f32 %v1934_v35, %v1040_v52 }
 0x2bf   :  { %v1062_v50 = vmul.f32 %v1934_v35, %v1039_v48 }
 0x2c0   :  { %v1086_v53 = vadd.f32 %v1939_v46, %v1063_v49 }
 0x2c1   :  { %v1085_v56 = vadd.f32 %v1939_v46, %v1062_v50 }
 0x2c2   :  { %1102 = vst [vmem:[#allocation2 + $0x78] sm:$0xff] %v1086_v53 }
 0x2c3   :  { %1101 = vst [vmem:[#allocation2 + $0x70] sm:$0xff] %v1085_v56 }
 0x2c4   :  { %1599 = shalt.err (!%p1596_p4)
}
 0x2c5   :  { %s1600_s29 = scalar_lea.hbm %s1997_s6, 2048 }
 0x2c6   :  { %p1601_p5 = scmp.ne.s32.totalorder %s1997_s6, %s1600_s29  ;;  %p1604_p6 = scmp.lt.u32.totalorder %s1600_s29, %s1997_s6 }
 0x2c8   :  { %p1606_p7 = pnand %p1604_p6, %p1601_p5 }
 0x2ca   :  { %1609 = shalt.err (!%p1606_p7)
}
 0x2cb   :  { %s1613_s9 = smov 128   ;;  %s1614_s10 = smov 8  }
 0x2cc   :  { %1114 = dma.vmem_to_hbm [thread:$0]  %s1109_s3, 2048, %s1997_s6, [#allocation3], %s1613_s9, %s1613_s9, %s1614_s10  }
 0x2cd   :  { %1610 = dma.done.wait [#allocation3], 2048  }
 0x2ce   :  { %1611 = vsyncadd [#allocation3], 4294965248 }
 0x2cf   :  { %1118 = vsyncpa [#allocation3], 1 }

</bundles_post_ra>
